<compile_context>
chip_gen: v7x
topology: tpu7x:2x2x1
jax: 0.10.0
libtpu: 0.0.40
codegen_flags: <defaults>
</compile_context>

<pallas_src>
import jax
import jax.numpy as jnp
from jax.experimental import pallas as pl
from jax.experimental.pallas import tpu as pltpu


def _round_up(x, m):
    return ((x + m - 1) // m) * m


# ----------------------------------------------------------------------------
# Fused kernel: embedding gather + L stacked GRU cells, one timestep, whole batch
# ----------------------------------------------------------------------------
def _make_encoder_kernel(L, Bp, Hp, In, Ep):
    """Builds the kernel for padded sizes.

    Refs:
      tok_ref : SMEM (Bp,) int32                 token ids (padded with 0)
      emb_ref : VMEM (Vp, Ep) f32                embedding table (lane-padded)
      w_ref   : VMEM (L, In+Hp, 6*Hp) bf16       block-diagonal [W_ih^T | W_hh^T] per layer
      b_ref   : VMEM (L, 1, 6*Hp) f32            [b_ih | b_hh] per layer (gate-padded)
      h0_ref  : VMEM (L, Bp, Hp) f32             previous hidden state
      out_ref : VMEM (Bp, Hp) f32                top-layer output
      hnew_ref: VMEM (L, Bp, Hp) f32             new hidden state
      xh_ref  : VMEM scratch (Bp, In+Hp) f32     concatenated [x | h] input per layer
    """

    def kernel(tok_ref, emb_ref, w_ref, b_ref, h0_ref, out_ref, hnew_ref, xh_ref):
        # ---- embedding lookup: gather token rows into the x-part of the scratch.
        xh_ref[...] = jnp.zeros_like(xh_ref)
        for b in range(Bp):
            tok = tok_ref[b]
            xh_ref[b:b + 1, 0:Ep] = emb_ref[pl.ds(tok, 1), :]
        # TODO(synk): training-mode nn.Dropout not implemented (eval semantics -> identity).

        # ---- stacked GRU, one fused MXU matmul per layer: [x | h] @ W_cat -> [gi | gh]
        for l in range(L):
            h_prev = h0_ref[l]                                  # (Bp, Hp) f32
            xh_ref[:, In:In + Hp] = h_prev
            xh = xh_ref[...]
            g = jnp.dot(xh.astype(jnp.bfloat16), w_ref[l],
                        preferred_element_type=jnp.float32) + b_ref[l]

            i_r = g[:, 0 * Hp:1 * Hp]
            i_z = g[:, 1 * Hp:2 * Hp]
            i_n = g[:, 2 * Hp:3 * Hp]
            h_r = g[:, 3 * Hp:4 * Hp]
            h_z = g[:, 4 * Hp:5 * Hp]
            h_n = g[:, 5 * Hp:6 * Hp]

            r = jax.nn.sigmoid(i_r + h_r)
            z = jax.nn.sigmoid(i_z + h_z)
            n = jnp.tanh(i_n + r * h_n)                         # b_hh_n stays inside r*(.)
            h_new = (1.0 - z) * n + z * h_prev

            hnew_ref[l] = h_new
            if l == L - 1:
                out_ref[...] = h_new
            else:
                # inter-layer dropout is identity (eval); feed h_new to next layer
                xh_ref[:, 0:Hp] = h_new

    return kernel


# ----------------------------------------------------------------------------
# One-time parameter preparation (layout + padding + bf16 cast) — NOT per step
# ----------------------------------------------------------------------------
def prepare_params(params):
    emb = jnp.asarray(params["embedding"], jnp.float32)
    V, E = emb.shape
    layers = params["layers"]
    L = len(layers)
    H = layers[0]["w_hh"].shape[-1]

    Vp = _round_up(V, 8)
    Ep = _round_up(E, 128)
    Hp = _round_up(H, 128)
    In = max(Ep, Hp)                      # width of the "x" slot in [x | h]

    emb_p = jnp.zeros((Vp, Ep), jnp.float32).at[:V, :E].set(emb)

    w_blocks, b_blocks = [], []
    for l, lw in enumerate(layers):
        in_real = E if l == 0 else H
        w_ih_t = jnp.asarray(lw["w_ih"], jnp.float32).T       # (in_real, 3H), gates [r,z,n]
        w_hh_t = jnp.asarray(lw["w_hh"], jnp.float32).T       # (H, 3H)
        b_ih = jnp.asarray(lw["b_ih"], jnp.float32)
        b_hh = jnp.asarray(lw["b_hh"], jnp.float32)

        W = jnp.zeros((In + Hp, 6 * Hp), jnp.float32)
        bvec = jnp.zeros((1, 6 * Hp), jnp.float32)
        for g in range(3):
            W = W.at[:in_real, g * Hp:g * Hp + H].set(w_ih_t[:, g * H:(g + 1) * H])
            W = W.at[In:In + H, (3 + g) * Hp:(3 + g) * Hp + H].set(
                w_hh_t[:, g * H:(g + 1) * H])
            bvec = bvec.at[0, g * Hp:g * Hp + H].set(b_ih[g * H:(g + 1) * H])
            bvec = bvec.at[0, (3 + g) * Hp:(3 + g) * Hp + H].set(b_hh[g * H:(g + 1) * H])
        w_blocks.append(W)
        b_blocks.append(bvec)

    return {
        "emb": emb_p,                                          # (Vp, Ep) f32
        "w_cat": jnp.stack(w_blocks, 0).astype(jnp.bfloat16),  # (L, In+Hp, 6Hp) bf16
        "b_cat": jnp.stack(b_blocks, 0),                       # (L, 1, 6Hp) f32
        "dims": (V, E, H, L, Vp, Ep, Hp, In),
    }


# ----------------------------------------------------------------------------
# EncoderRNNWithoutAttn.forward(input, batch_size, hidden)
# ----------------------------------------------------------------------------
def encoder_forward(prep, token_ids, batch_size, hidden):
    V, E, H, L, Vp, Ep, Hp, In = prep["dims"]
    B = batch_size
    Bp = _round_up(max(B, 8), 8)

    tok = jnp.zeros((Bp,), jnp.int32).at[:B].set(token_ids.astype(jnp.int32))
    h0 = jnp.zeros((L, Bp, Hp), jnp.float32).at[:, :B, :H].set(
        hidden.astype(jnp.float32))

    kernel = _make_encoder_kernel(L, Bp, Hp, In, Ep)
    vmem = pltpu.MemorySpace.VMEM
    smem = pltpu.MemorySpace.SMEM

    flops = 2 * L * Bp * (In + Hp) * (6 * Hp)
    transcendentals = 3 * L * Bp * Hp
    bytes_accessed = (prep["w_cat"].size * 2 + prep["emb"].size * 4 +
                      prep["b_cat"].size * 4 + (2 * L + 1) * Bp * Hp * 4 + Bp * 4)

    out_p, hnew_p = pl.pallas_call(
        kernel,
        out_shape=(jax.ShapeDtypeStruct((Bp, Hp), jnp.float32),
                   jax.ShapeDtypeStruct((L, Bp, Hp), jnp.float32)),
        in_specs=[
            pl.BlockSpec(memory_space=smem),   # token ids (scalars)
            pl.BlockSpec(memory_space=vmem),   # embedding table
            pl.BlockSpec(memory_space=vmem),   # packed weights (bf16)
            pl.BlockSpec(memory_space=vmem),   # packed biases (f32)
            pl.BlockSpec(memory_space=vmem),   # previous hidden state
        ],
        out_specs=(pl.BlockSpec(memory_space=vmem),
                   pl.BlockSpec(memory_space=vmem)),
        scratch_shapes=[pltpu.VMEM((Bp, In + Hp), jnp.float32)],
        cost_estimate=pl.CostEstimate(flops=flops,
                                      transcendentals=transcendentals,
                                      bytes_accessed=bytes_accessed),
    )(tok, prep["emb"], prep["w_cat"], prep["b_cat"], h0)

    output = out_p[:B, :H].reshape(1, B, H)         # (1, B, H) — top layer output
    hidden_new = hnew_p[:, :B, :H]                  # (L, B, H)
    return output, hidden_new


# ----------------------------------------------------------------------------
# Parameter / state construction and a pure-JAX reference for verification
# ----------------------------------------------------------------------------
def init_params(key, input_size, embedding_size, hidden_size, num_layers):
    keys = jax.random.split(key, 1 + 4 * num_layers)
    params = {"embedding": jax.random.normal(keys[0], (input_size, embedding_size),
                                             jnp.float32) * 0.1}
    layers = []
    for l in range(num_layers):
        in_feat = embedding_size if l == 0 else hidden_size
        k = keys[1 + 4 * l: 1 + 4 * (l + 1)]
        layers.append({
            "w_ih": jax.random.normal(k[0], (3 * hidden_size, in_feat), jnp.float32) * 0.1,
            "w_hh": jax.random.normal(k[1], (3 * hidden_size, hidden_size), jnp.float32) * 0.1,
            "b_ih": jax.random.normal(k[2], (3 * hidden_size,), jnp.float32) * 0.1,
            "b_hh": jax.random.normal(k[3], (3 * hidden_size,), jnp.float32) * 0.1,
        })
    params["layers"] = layers
    return params


def init_hidden(batch_size, num_layers, hidden_size):
    # EncoderRNNWithoutAttn.initHidden (bi_directional=False)
    return jnp.zeros((num_layers, batch_size, hidden_size), jnp.float32)


def reference_forward(params, token_ids, batch_size, hidden):
    x = params["embedding"][token_ids]                        # (B, E); eval dropout = identity
    H = hidden.shape[-1]
    new_h = []
    for l, lw in enumerate(params["layers"]):
        h = hidden[l]
        gi = x @ lw["w_ih"].T + lw["b_ih"]
        gh = h @ lw["w_hh"].T + lw["b_hh"]
        i_r, i_z, i_n = gi[:, :H], gi[:, H:2 * H], gi[:, 2 * H:]
        h_r, h_z, h_n = gh[:, :H], gh[:, H:2 * H], gh[:, 2 * H:]
        r = jax.nn.sigmoid(i_r + h_r)
        z = jax.nn.sigmoid(i_z + h_z)
        n = jnp.tanh(i_n + r * h_n)
        x = (1.0 - z) * n + z * h
        new_h.append(x)
    return x.reshape(1, batch_size, H), jnp.stack(new_h, axis=0)


if __name__ == "__main__":
    # Small config consistent with the module's constructor
    input_size = 16          # vocab size
    embedding_size = 32
    hidden_size = 32
    num_layers_encoder = 2
    batch_size = 4

    key = jax.random.PRNGKey(0)
    k_params, k_tokens = jax.random.split(key)

    params = init_params(k_params, input_size, embedding_size, hidden_size,
                         num_layers_encoder)
    token_ids = jax.random.randint(k_tokens, (batch_size,), 0, input_size, jnp.int32)
    hidden0 = init_hidden(batch_size, num_layers_encoder, hidden_size)

    prep = prepare_params(params)                     # one-time weight layout / bf16 cast
    output, hidden1 = encoder_forward(prep, token_ids, batch_size, hidden0)
    jax.block_until_ready((output, hidden1))

    assert output.shape == (1, batch_size, hidden_size)
    assert hidden1.shape == (num_layers_encoder, batch_size, hidden_size)

    ref_out, ref_hidden = reference_forward(params, token_ids, batch_size, hidden0)
    err = max(float(jnp.max(jnp.abs(output - ref_out))),
              float(jnp.max(jnp.abs(hidden1 - ref_hidden))))
    assert err < 5e-2, f"mismatch vs reference: {err}"

    print("KERNEL_OK")
</pallas_src>

<mosaic_0001>
module attributes {stable_mosaic.version = 11 : i64} {
  func.func @kernel(%arg0: memref<8xi32, #tpu.memory_space<smem>>, %arg1: memref<16x128xf32, #tpu.memory_space<vmem>>, %arg2: memref<2x256x768xbf16, #tpu.memory_space<vmem>>, %arg3: memref<2x1x768xf32, #tpu.memory_space<vmem>>, %arg4: memref<2x8x128xf32, #tpu.memory_space<vmem>>, %arg5: memref<8x128xf32, #tpu.memory_space<vmem>>, %arg6: memref<2x8x128xf32, #tpu.memory_space<vmem>>, %arg7: memref<8x256xf32, #tpu.memory_space<vmem>>) attributes {dimension_semantics = [], scalar_prefetch = 0 : i64, scratch_operands = 1 : i64, tpu.core_type = #tpu.core_type<tc>} {
    %cst = arith.constant 0.000000e+00 : f32
    %0 = vector.broadcast %cst : f32 to vector<8x256xf32>
    %c0 = arith.constant 0 : index
    %c0_0 = arith.constant 0 : index
    %1 = vector.load %arg7[%c0, %c0_0] : memref<8x256xf32, #tpu.memory_space<vmem>>, vector<8x256xf32>
    tpu.vector_store %arg7[%c0, %c0_0], %0 {strides = array<i32>} : memref<8x256xf32, #tpu.memory_space<vmem>>, vector<8x256xf32>,
    %c0_1 = arith.constant 0 : index
    %2 = memref.load %arg0[%c0_1] : memref<8xi32, #tpu.memory_space<smem>>
    %3 = arith.index_cast %2 : i32 to index
    %c0_2 = arith.constant 0 : index
    %4 = vector.load %arg1[%3, %c0_2] : memref<16x128xf32, #tpu.memory_space<vmem>>, vector<1x128xf32>
    %c0_3 = arith.constant 0 : index
    %c0_4 = arith.constant 0 : index
    %5 = vector.load %arg7[%c0_3, %c0_4] : memref<8x256xf32, #tpu.memory_space<vmem>>, vector<1x128xf32>
    tpu.vector_store %arg7[%c0_3, %c0_4], %4 {strides = array<i32>} : memref<8x256xf32, #tpu.memory_space<vmem>>, vector<1x128xf32>,
    %c1 = arith.constant 1 : index
    %6 = memref.load %arg0[%c1] : memref<8xi32, #tpu.memory_space<smem>>
    %7 = arith.index_cast %6 : i32 to index
    %c0_5 = arith.constant 0 : index
    %8 = vector.load %arg1[%7, %c0_5] : memref<16x128xf32, #tpu.memory_space<vmem>>, vector<1x128xf32>
    %c1_6 = arith.constant 1 : index
    %c0_7 = arith.constant 0 : index
    %9 = vector.load %arg7[%c1_6, %c0_7] : memref<8x256xf32, #tpu.memory_space<vmem>>, vector<1x128xf32>
    tpu.vector_store %arg7[%c1_6, %c0_7], %8 {strides = array<i32>} : memref<8x256xf32, #tpu.memory_space<vmem>>, vector<1x128xf32>,
    %c2 = arith.constant 2 : index
    %10 = memref.load %arg0[%c2] : memref<8xi32, #tpu.memory_space<smem>>
    %11 = arith.index_cast %10 : i32 to index
    %c0_8 = arith.constant 0 : index
    %12 = vector.load %arg1[%11, %c0_8] : memref<16x128xf32, #tpu.memory_space<vmem>>, vector<1x128xf32>
    %c2_9 = arith.constant 2 : index
    %c0_10 = arith.constant 0 : index
    %13 = vector.load %arg7[%c2_9, %c0_10] : memref<8x256xf32, #tpu.memory_space<vmem>>, vector<1x128xf32>
    tpu.vector_store %arg7[%c2_9, %c0_10], %12 {strides = array<i32>} : memref<8x256xf32, #tpu.memory_space<vmem>>, vector<1x128xf32>,
    %c3 = arith.constant 3 : index
    %14 = memref.load %arg0[%c3] : memref<8xi32, #tpu.memory_space<smem>>
    %15 = arith.index_cast %14 : i32 to index
    %c0_11 = arith.constant 0 : index
    %16 = vector.load %arg1[%15, %c0_11] : memref<16x128xf32, #tpu.memory_space<vmem>>, vector<1x128xf32>
    %c3_12 = arith.constant 3 : index
    %c0_13 = arith.constant 0 : index
    %17 = vector.load %arg7[%c3_12, %c0_13] : memref<8x256xf32, #tpu.memory_space<vmem>>, vector<1x128xf32>
    tpu.vector_store %arg7[%c3_12, %c0_13], %16 {strides = array<i32>} : memref<8x256xf32, #tpu.memory_space<vmem>>, vector<1x128xf32>,
    %c4 = arith.constant 4 : index
    %18 = memref.load %arg0[%c4] : memref<8xi32, #tpu.memory_space<smem>>
    %19 = arith.index_cast %18 : i32 to index
    %c0_14 = arith.constant 0 : index
    %20 = vector.load %arg1[%19, %c0_14] : memref<16x128xf32, #tpu.memory_space<vmem>>, vector<1x128xf32>
    %c4_15 = arith.constant 4 : index
    %c0_16 = arith.constant 0 : index
    %21 = vector.load %arg7[%c4_15, %c0_16] : memref<8x256xf32, #tpu.memory_space<vmem>>, vector<1x128xf32>
    tpu.vector_store %arg7[%c4_15, %c0_16], %20 {strides = array<i32>} : memref<8x256xf32, #tpu.memory_space<vmem>>, vector<1x128xf32>,
    %c5 = arith.constant 5 : index
    %22 = memref.load %arg0[%c5] : memref<8xi32, #tpu.memory_space<smem>>
    %23 = arith.index_cast %22 : i32 to index
    %c0_17 = arith.constant 0 : index
    %24 = vector.load %arg1[%23, %c0_17] : memref<16x128xf32, #tpu.memory_space<vmem>>, vector<1x128xf32>
    %c5_18 = arith.constant 5 : index
    %c0_19 = arith.constant 0 : index
    %25 = vector.load %arg7[%c5_18, %c0_19] : memref<8x256xf32, #tpu.memory_space<vmem>>, vector<1x128xf32>
    tpu.vector_store %arg7[%c5_18, %c0_19], %24 {strides = array<i32>} : memref<8x256xf32, #tpu.memory_space<vmem>>, vector<1x128xf32>,
    %c6 = arith.constant 6 : index
    %26 = memref.load %arg0[%c6] : memref<8xi32, #tpu.memory_space<smem>>
    %27 = arith.index_cast %26 : i32 to index
    %c0_20 = arith.constant 0 : index
    %28 = vector.load %arg1[%27, %c0_20] : memref<16x128xf32, #tpu.memory_space<vmem>>, vector<1x128xf32>
    %c6_21 = arith.constant 6 : index
    %c0_22 = arith.constant 0 : index
    %29 = vector.load %arg7[%c6_21, %c0_22] : memref<8x256xf32, #tpu.memory_space<vmem>>, vector<1x128xf32>
    tpu.vector_store %arg7[%c6_21, %c0_22], %28 {strides = array<i32>} : memref<8x256xf32, #tpu.memory_space<vmem>>, vector<1x128xf32>,
    %c7 = arith.constant 7 : index
    %30 = memref.load %arg0[%c7] : memref<8xi32, #tpu.memory_space<smem>>
    %31 = arith.index_cast %30 : i32 to index
    %c0_23 = arith.constant 0 : index
    %32 = vector.load %arg1[%31, %c0_23] : memref<16x128xf32, #tpu.memory_space<vmem>>, vector<1x128xf32>
    %c7_24 = arith.constant 7 : index
    %c0_25 = arith.constant 0 : index
    %33 = vector.load %arg7[%c7_24, %c0_25] : memref<8x256xf32, #tpu.memory_space<vmem>>, vector<1x128xf32>
    tpu.vector_store %arg7[%c7_24, %c0_25], %32 {strides = array<i32>} : memref<8x256xf32, #tpu.memory_space<vmem>>, vector<1x128xf32>,
    %c0_26 = arith.constant 0 : index
    %c0_27 = arith.constant 0 : index
    %c0_28 = arith.constant 0 : index
    %34 = vector.load %arg4[%c0_26, %c0_27, %c0_28] : memref<2x8x128xf32, #tpu.memory_space<vmem>>, vector<1x8x128xf32>
    %35 = vector.shape_cast %34 : vector<1x8x128xf32> to vector<8x128xf32>
    %c0_29 = arith.constant 0 : index
    %c128 = arith.constant 128 : index
    %36 = vector.load %arg7[%c0_29, %c128] : memref<8x256xf32, #tpu.memory_space<vmem>>, vector<8x128xf32>
    tpu.vector_store %arg7[%c0_29, %c128], %35 {strides = array<i32>} : memref<8x256xf32, #tpu.memory_space<vmem>>, vector<8x128xf32>,
    %c0_30 = arith.constant 0 : index
    %c0_31 = arith.constant 0 : index
    %37 = vector.load %arg7[%c0_30, %c0_31] : memref<8x256xf32, #tpu.memory_space<vmem>>, vector<8x256xf32>
    %38 = arith.truncf %37 : vector<8x256xf32> to vector<8x256xbf16>
    %c0_32 = arith.constant 0 : index
    %c0_33 = arith.constant 0 : index
    %c0_34 = arith.constant 0 : index
    %39 = vector.load %arg2[%c0_32, %c0_33, %c0_34] : memref<2x256x768xbf16, #tpu.memory_space<vmem>>, vector<1x256x768xbf16>
    %40 = vector.shape_cast %39 : vector<1x256x768xbf16> to vector<256x768xbf16>
    %cst_35 = arith.constant dense<0.000000e+00> : vector<8x768xf32>
    %41 = tpu.matmul %38, %40, %cst_35 {dimension_numbers = #tpu.dot_dimension_numbers<[1], [0], [0], [1], [0, 0, 1, 1], [], []>} : vector<8x256xbf16>, vector<256x768xbf16>, vector<8x768xf32> -> vector<8x768xf32>
    %c0_36 = arith.constant 0 : index
    %c0_37 = arith.constant 0 : index
    %c0_38 = arith.constant 0 : index
    %42 = vector.load %arg3[%c0_36, %c0_37, %c0_38] : memref<2x1x768xf32, #tpu.memory_space<vmem>>, vector<1x1x768xf32>
    %43 = vector.shape_cast %42 : vector<1x1x768xf32> to vector<1x768xf32>
    %44 = vector.broadcast %43 : vector<1x768xf32> to vector<8x768xf32>
    %45 = arith.addf %41, %44 : vector<8x768xf32>
    %46 = vector.extract_strided_slice %45 {offsets = [0, 0], sizes = [8, 128], strides = [1, 1]} : vector<8x768xf32> to vector<8x128xf32>
    %47 = vector.extract_strided_slice %45 {offsets = [0, 128], sizes = [8, 128], strides = [1, 1]} : vector<8x768xf32> to vector<8x128xf32>
    %48 = vector.extract_strided_slice %45 {offsets = [0, 256], sizes = [8, 128], strides = [1, 1]} : vector<8x768xf32> to vector<8x128xf32>
    %49 = vector.extract_strided_slice %45 {offsets = [0, 384], sizes = [8, 128], strides = [1, 1]} : vector<8x768xf32> to vector<8x128xf32>
    %50 = vector.extract_strided_slice %45 {offsets = [0, 512], sizes = [8, 128], strides = [1, 1]} : vector<8x768xf32> to vector<8x128xf32>
    %51 = vector.extract_strided_slice %45 {offsets = [0, 640], sizes = [8, 128], strides = [1, 1]} : vector<8x768xf32> to vector<8x128xf32>
    %52 = arith.addf %46, %49 : vector<8x128xf32>
    %53 = arith.negf %52 : vector<8x128xf32>
    %54 = math.exp %53 : vector<8x128xf32>
    %cst_39 = arith.constant 1.000000e+00 : f32
    %55 = vector.broadcast %cst_39 : f32 to vector<8x128xf32>
    %56 = arith.addf %55, %54 : vector<8x128xf32>
    %57 = arith.divf %55, %56 : vector<8x128xf32>
    %58 = arith.addf %47, %50 : vector<8x128xf32>
    %59 = arith.negf %58 : vector<8x128xf32>
    %60 = math.exp %59 : vector<8x128xf32>
    %cst_40 = arith.constant 1.000000e+00 : f32
    %61 = vector.broadcast %cst_40 : f32 to vector<8x128xf32>
    %62 = arith.addf %61, %60 : vector<8x128xf32>
    %63 = arith.divf %61, %62 : vector<8x128xf32>
    %64 = arith.mulf %57, %51 : vector<8x128xf32>
    %65 = arith.addf %48, %64 : vector<8x128xf32>
    %66 = math.tanh %65 : vector<8x128xf32>
    %cst_41 = arith.constant 1.000000e+00 : f32
    %67 = vector.broadcast %cst_41 : f32 to vector<8x128xf32>
    %68 = arith.subf %67, %63 : vector<8x128xf32>
    %69 = arith.mulf %68, %66 : vector<8x128xf32>
    %70 = arith.mulf %63, %35 : vector<8x128xf32>
    %71 = arith.addf %69, %70 : vector<8x128xf32>
    %c0_42 = arith.constant 0 : index
    %c0_43 = arith.constant 0 : index
    %c0_44 = arith.constant 0 : index
    %72 = vector.load %arg6[%c0_42, %c0_43, %c0_44] : memref<2x8x128xf32, #tpu.memory_space<vmem>>, vector<1x8x128xf32>
    %73 = vector.shape_cast %72 : vector<1x8x128xf32> to vector<8x128xf32>
    %74 = vector.shape_cast %71 : vector<8x128xf32> to vector<1x8x128xf32>
    tpu.vector_store %arg6[%c0_42, %c0_43, %c0_44], %74 {strides = array<i32>} : memref<2x8x128xf32, #tpu.memory_space<vmem>>, vector<1x8x128xf32>,
    %c0_45 = arith.constant 0 : index
    %c0_46 = arith.constant 0 : index
    %75 = vector.load %arg7[%c0_45, %c0_46] : memref<8x256xf32, #tpu.memory_space<vmem>>, vector<8x128xf32>
    tpu.vector_store %arg7[%c0_45, %c0_46], %71 {strides = array<i32>} : memref<8x256xf32, #tpu.memory_space<vmem>>, vector<8x128xf32>,
    %c1_47 = arith.constant 1 : index
    %c0_48 = arith.constant 0 : index
    %c0_49 = arith.constant 0 : index
    %76 = vector.load %arg4[%c1_47, %c0_48, %c0_49] : memref<2x8x128xf32, #tpu.memory_space<vmem>>, vector<1x8x128xf32>
    %77 = vector.shape_cast %76 : vector<1x8x128xf32> to vector<8x128xf32>
    %c0_50 = arith.constant 0 : index
    %c128_51 = arith.constant 128 : index
    %78 = vector.load %arg7[%c0_50, %c128_51] : memref<8x256xf32, #tpu.memory_space<vmem>>, vector<8x128xf32>
    tpu.vector_store %arg7[%c0_50, %c128_51], %77 {strides = array<i32>} : memref<8x256xf32, #tpu.memory_space<vmem>>, vector<8x128xf32>,
    %c0_52 = arith.constant 0 : index
    %c0_53 = arith.constant 0 : index
    %79 = vector.load %arg7[%c0_52, %c0_53] : memref<8x256xf32, #tpu.memory_space<vmem>>, vector<8x256xf32>
    %80 = arith.truncf %79 : vector<8x256xf32> to vector<8x256xbf16>
    %c1_54 = arith.constant 1 : index
    %c0_55 = arith.constant 0 : index
    %c0_56 = arith.constant 0 : index
    %81 = vector.load %arg2[%c1_54, %c0_55, %c0_56] : memref<2x256x768xbf16, #tpu.memory_space<vmem>>, vector<1x256x768xbf16>
    %82 = vector.shape_cast %81 : vector<1x256x768xbf16> to vector<256x768xbf16>
    %cst_57 = arith.constant dense<0.000000e+00> : vector<8x768xf32>
    %83 = tpu.matmul %80, %82, %cst_57 {dimension_numbers = #tpu.dot_dimension_numbers<[1], [0], [0], [1], [0, 0, 1, 1], [], []>} : vector<8x256xbf16>, vector<256x768xbf16>, vector<8x768xf32> -> vector<8x768xf32>
    %c1_58 = arith.constant 1 : index
    %c0_59 = arith.constant 0 : index
    %c0_60 = arith.constant 0 : index
    %84 = vector.load %arg3[%c1_58, %c0_59, %c0_60] : memref<2x1x768xf32, #tpu.memory_space<vmem>>, vector<1x1x768xf32>
    %85 = vector.shape_cast %84 : vector<1x1x768xf32> to vector<1x768xf32>
    %86 = vector.broadcast %85 : vector<1x768xf32> to vector<8x768xf32>
    %87 = arith.addf %83, %86 : vector<8x768xf32>
    %88 = vector.extract_strided_slice %87 {offsets = [0, 0], sizes = [8, 128], strides = [1, 1]} : vector<8x768xf32> to vector<8x128xf32>
    %89 = vector.extract_strided_slice %87 {offsets = [0, 128], sizes = [8, 128], strides = [1, 1]} : vector<8x768xf32> to vector<8x128xf32>
    %90 = vector.extract_strided_slice %87 {offsets = [0, 256], sizes = [8, 128], strides = [1, 1]} : vector<8x768xf32> to vector<8x128xf32>
    %91 = vector.extract_strided_slice %87 {offsets = [0, 384], sizes = [8, 128], strides = [1, 1]} : vector<8x768xf32> to vector<8x128xf32>
    %92 = vector.extract_strided_slice %87 {offsets = [0, 512], sizes = [8, 128], strides = [1, 1]} : vector<8x768xf32> to vector<8x128xf32>
    %93 = vector.extract_strided_slice %87 {offsets = [0, 640], sizes = [8, 128], strides = [1, 1]} : vector<8x768xf32> to vector<8x128xf32>
    %94 = arith.addf %88, %91 : vector<8x128xf32>
    %95 = arith.negf %94 : vector<8x128xf32>
    %96 = math.exp %95 : vector<8x128xf32>
    %cst_61 = arith.constant 1.000000e+00 : f32
    %97 = vector.broadcast %cst_61 : f32 to vector<8x128xf32>
    %98 = arith.addf %97, %96 : vector<8x128xf32>
    %99 = arith.divf %97, %98 : vector<8x128xf32>
    %100 = arith.addf %89, %92 : vector<8x128xf32>
    %101 = arith.negf %100 : vector<8x128xf32>
    %102 = math.exp %101 : vector<8x128xf32>
    %cst_62 = arith.constant 1.000000e+00 : f32
    %103 = vector.broadcast %cst_62 : f32 to vector<8x128xf32>
    %104 = arith.addf %103, %102 : vector<8x128xf32>
    %105 = arith.divf %103, %104 : vector<8x128xf32>
    %106 = arith.mulf %99, %93 : vector<8x128xf32>
    %107 = arith.addf %90, %106 : vector<8x128xf32>
    %108 = math.tanh %107 : vector<8x128xf32>
    %cst_63 = arith.constant 1.000000e+00 : f32
    %109 = vector.broadcast %cst_63 : f32 to vector<8x128xf32>
    %110 = arith.subf %109, %105 : vector<8x128xf32>
    %111 = arith.mulf %110, %108 : vector<8x128xf32>
    %112 = arith.mulf %105, %77 : vector<8x128xf32>
    %113 = arith.addf %111, %112 : vector<8x128xf32>
    %c1_64 = arith.constant 1 : index
    %c0_65 = arith.constant 0 : index
    %c0_66 = arith.constant 0 : index
    %114 = vector.load %arg6[%c1_64, %c0_65, %c0_66] : memref<2x8x128xf32, #tpu.memory_space<vmem>>, vector<1x8x128xf32>
    %115 = vector.shape_cast %114 : vector<1x8x128xf32> to vector<8x128xf32>
    %116 = vector.shape_cast %113 : vector<8x128xf32> to vector<1x8x128xf32>
    tpu.vector_store %arg6[%c1_64, %c0_65, %c0_66], %116 {strides = array<i32>} : memref<2x8x128xf32, #tpu.memory_space<vmem>>, vector<1x8x128xf32>,
    %c0_67 = arith.constant 0 : index
    %c0_68 = arith.constant 0 : index
    %117 = vector.load %arg5[%c0_67, %c0_68] : memref<8x128xf32, #tpu.memory_space<vmem>>, vector<8x128xf32>
    tpu.vector_store %arg5[%c0_67, %c0_68], %113 {strides = array<i32>} : memref<8x128xf32, #tpu.memory_space<vmem>>, vector<8x128xf32>,
    return
  }
}

</mosaic_0001>

<bundles_post_ra>
// kernel: tpu_custom_call.1
= control target key start
LH: loop header
LB: loop body
LE: loop exit
PB: predicated region body
PF: predicated region fallthrough
CT: control target
= control target key end

     0   :  { %12 = vsyncpa [#allocation6], 0  ;;  %s2600_s0 = inlined_call_operand.hbm [shape: s32[8], index: 0, kind: input, shape index: {}]   ;;  %s2601_s1 = inlined_call_operand.hbm [shape: f32[16,128], index: 1, kind: input, shape index: {}]   ;;  %s2602_s2 = inlined_call_operand.hbm [shape: bf16[2,256,768], index: 2, kind: input, shape index: {}]   ;;  %s2603_s3 = inlined_call_operand.hbm [shape: f32[2,1,768], index: 3, kind: input, shape index: {}]   ;;  %s2604_s4 = inlined_call_operand.hbm [shape: f32[2,8,128], index: 4, kind: input, shape index: {}]   ;;  %s2605_s5 = inlined_call_operand.hbm [shape: f32[8,128], index: 5, kind: output, shape index: {0}]   ;;  %s2606_s6 = inlined_call_operand.hbm [shape: f32[2,8,128], index: 6, kind: output, shape index: {1}]  }
   0x1   :  { %13 = vsyncpa [#allocation4], 0 }
   0x2   :  { %14 = vsyncpa [#allocation9], 0 }
   0x3   :  { %15 = vsyncpa [#allocation12], 0 }
   0x4   :  { %16 = vsyncpa [#allocation5], 0 }
   0x5   :  { %17 = vsyncpa [#allocation15], 0  ;;  %s2370_s21 = smov [#allocation8]   ;;  %s2216_s25 = scalar_lea.hbm %s2602_s2, 24576 }
   0x6   :  { %s43_s22 = sshll.u32 %s2370_s21, 4  ;;  %p2217_p0 = scmp.ne.s32.totalorder %s2602_s2, %s2216_s25  ;;  %s44_s22 = int_to_ptr.vmem [resolvable:$true] %s43_s22 }
   0x7   :  { %p2220_p1 = scmp.lt.u32.totalorder %s2216_s25, %s2602_s2 }
   0x9   :  { %p2222_p2 = pnand %p2220_p1, %p2217_p0 }
   0xb   :  { %2225 = shalt.err (!%p2222_p2)
}
   0xc   :  { %s2226_s30 = scalar_lea.vmem %s44_s22, 24576  ;;  %p2231_p4 = scmp.lt.s32.totalorder %s44_s22, %s44_s22 }
   0xd   :  { %p2227_p3 = scmp.ne.s32.totalorder %s44_s22, %s2226_s30  ;;  %p2232_p5 = scmp.lt.s32.totalorder %s2226_s30, %s2226_s30 }
   0xf   :  { %p2233_p6 = por %p2232_p5, %p2231_p4 }
  0x11   :  { %p2234_p7 = pnand %p2233_p6, %p2227_p3 }
  0x13   :  { %2237 = shalt.err (!%p2234_p7)
}
  0x14   :  { %s2371_s7 = smov 384   ;;  %s2372_s8 = smov 24  }
  0x15   :  { %49 = dma.hbm_to_vmem [thread:$0]  %s2602_s2, 24576, %s44_s22, [#allocation9], %s2371_s7, %s2371_s7, %s2372_s8  }
  0x16   :  { %s2238_s13 = scalar_lea.hbm %s2600_s0, 16 }
  0x17   :  { %p2239_p8 = scmp.ne.s32.totalorder %s2600_s0, %s2238_s13  ;;  %p2242_p9 = scmp.lt.u32.totalorder %s2238_s13, %s2600_s0 }
  0x19   :  { %p2244_p10 = pnand %p2242_p9, %p2239_p8 }
  0x1b   :  { %2247 = shalt.err (!%p2244_p10)
}
  0x1c   :  { %s2373_s18 = smov [#allocation3]   ;;  %s2374_s2 = smov [#allocation7]  }
  0x1d   :  { %25 = dma.hbm_to_smem %s2600_s0, 16, %s2373_s18, [#allocation6]  }
  0x1e   :  { %s31_s21 = sshll.u32 %s2374_s2, 4  ;;  %s2248_s24 = scalar_lea.hbm %s2601_s1, 256  ;;  %s32_s21 = int_to_ptr.vmem [resolvable:$true] %s31_s21 }
  0x1f   :  { %p2249_p11 = scmp.ne.s32.totalorder %s2601_s1, %s2248_s24  ;;  %p2252_p12 = scmp.lt.u32.totalorder %s2248_s24, %s2601_s1 }
  0x21   :  { %p2254_p13 = pnand %p2252_p12, %p2249_p11 }
  0x23   :  { %2257 = shalt.err (!%p2254_p13)
}
  0x24   :  { %s2258_s29 = scalar_lea.vmem %s32_s21, 256  ;;  %p2263_p1 = scmp.lt.s32.totalorder %s32_s21, %s32_s21 }
  0x25   :  { %p2259_p0 = scmp.ne.s32.totalorder %s32_s21, %s2258_s29  ;;  %p2264_p2 = scmp.lt.s32.totalorder %s2258_s29, %s2258_s29 }
  0x27   :  { %p2265_p3 = por %p2264_p2, %p2263_p1 }
  0x29   :  { %p2266_p4 = pnand %p2265_p3, %p2259_p0 }
  0x2b   :  { %2269 = shalt.err (!%p2266_p4)
}
  0x2c   :  { %s2375_s0 = smov 128   ;;  %s2376_s30 = smov 8  }
  0x2d   :  { %37 = dma.hbm_to_vmem [thread:$0]  %s2601_s1, 256, %s32_s21, [#allocation4], %s2375_s0, %s2375_s0, %s2376_s30  }
  0x2e   :  { %s2377_s9 = smov [#allocation10]   ;;  %s2270_s13 = scalar_lea.hbm %s2603_s3, 192 }
  0x2f   :  { %s55_s10 = sshll.u32 %s2377_s9, 4  ;;  %p2271_p5 = scmp.ne.s32.totalorder %s2603_s3, %s2270_s13  ;;  %s56_s10 = int_to_ptr.vmem [resolvable:$true] %s55_s10 }
  0x30   :  { %p2274_p6 = scmp.lt.u32.totalorder %s2270_s13, %s2603_s3 }
  0x32   :  { %p2276_p7 = pnand %p2274_p6, %p2271_p5 }
  0x34   :  { %2279 = shalt.err (!%p2276_p7)
}
  0x35   :  { %s2280_s18 = scalar_lea.vmem %s56_s10, 192  ;;  %p2285_p9 = scmp.lt.s32.totalorder %s56_s10, %s56_s10 }
  0x36   :  { %p2281_p8 = scmp.ne.s32.totalorder %s56_s10, %s2280_s18  ;;  %p2286_p10 = scmp.lt.s32.totalorder %s2280_s18, %s2280_s18 }
  0x38   :  { %p2287_p11 = por %p2286_p10, %p2285_p9 }
  0x3a   :  { %p2288_p12 = pnand %p2287_p11, %p2281_p8 }
  0x3c   :  { %2291 = shalt.err (!%p2288_p12)
}
  0x3d   :  { %s2378_s1 = smov 96   ;;  %s2379_s19 = smov 6  }
  0x3e   :  { %61 = dma.hbm_to_vmem [thread:$0]  %s2603_s3, 192, %s56_s10, [#allocation9], %s2378_s1, %s2378_s1, %s2379_s19  }
  0x3f   :  { %s2380_s21 = smov [#allocation11]   ;;  %s2292_s25 = scalar_lea.hbm %s2604_s4, 256 }
  0x40   :  { %s67_s22 = sshll.u32 %s2380_s21, 4  ;;  %p2293_p13 = scmp.ne.s32.totalorder %s2604_s4, %s2292_s25  ;;  %s68_s22 = int_to_ptr.vmem [resolvable:$true] %s67_s22 }
  0x41   :  { %p2296_p0 = scmp.lt.u32.totalorder %s2292_s25, %s2604_s4 }
  0x43   :  { %p2298_p1 = pnand %p2296_p0, %p2293_p13 }
  0x45   :  { %2301 = shalt.err (!%p2298_p1)
}
  0x46   :  { %s2302_s7 = scalar_lea.vmem %s68_s22, 256  ;;  %p2307_p3 = scmp.lt.s32.totalorder %s68_s22, %s68_s22 }
  0x47   :  { %p2303_p2 = scmp.ne.s32.totalorder %s68_s22, %s2302_s7  ;;  %p2308_p4 = scmp.lt.s32.totalorder %s2302_s7, %s2302_s7 }
  0x49   :  { %p2309_p5 = por %p2308_p4, %p2307_p3 }
  0x4b   :  { %p2310_p6 = pnand %p2309_p5, %p2303_p2 }
  0x4d   :  { %2313 = shalt.err (!%p2310_p6)
}
  0x4e   :  { %73 = dma.hbm_to_vmem [thread:$0]  %s2604_s4, 256, %s68_s22, [#allocation12], %s2375_s0, %s2375_s0, %s2376_s30  }
  0x4f   :  { %2358 = dma.done.wait [#allocation6], 16  }
  0x50   :  { %2359 = vsyncadd [#allocation6], 4294967280 }
  0x51   :  { %2360 = dma.done.wait [#allocation4], 256  }
  0x52   :  { %2361 = vsyncadd [#allocation4], 4294967040 }
  0x53   :  { %2362 = dma.done.wait [#allocation9], 24768  }
  0x54   :  { %2363 = vsyncadd [#allocation9], 4294942528 }
  0x55   :  { %2364 = dma.done.wait [#allocation12], 256  }
  0x56   :  { %2365 = vsyncadd [#allocation12], 4294967040 }
  0x57   :  { %89 = sfence }
  0x58   :  { %v1907_v0 = vld [vmem:[#allocation8 + $0x4] ss:$24 sps:$4 sm:$0xff]   ;;  %v2381_v2 = vmov 0.0   ;;  %v1911_v3 = vld [vmem:[#allocation8] ss:$24 sps:$4 sm:$0xff]   ;;  %s2485_s4 = sld [smem:[#allocation3]] }
  0x59   :  { %v1909_v1 = vld [vmem:[#allocation8 + $0xc] ss:$24 sps:$4 sm:$0xff]   ;;  %90 = vst [vmem:[#allocation2] sm:$0xff] %v2381_v2  ;;  %738 = vmatprep.subr.bf16.mxu0 %v1907_v0  ;;  %v1912_v4 = vld [vmem:[#allocation8 + $0x8] ss:$24 sps:$4 sm:$0xff]   ;;  %s2487_s9 = sld [smem:[#allocation3 + $0x1]] }
  0x5a   :  { %779 = vmatprep.subr.bf16.mxu1 %v1909_v1  ;;  %v1913_v5 = vld [vmem:[#allocation8 + $0x34] ss:$24 sps:$4 sm:$0xff]   ;;  %739 = vmatpush1.bf16.msra.mxu0 %v1911_v3  ;;  %v1917_v7 = vld [vmem:[#allocation8 + $0x30] ss:$24 sps:$4 sm:$0xff]   ;;  %v1919_v9 = vld [vmem:[#allocation8 + $0x64] ss:$24 sps:$4 sm:$0xff]  }
  0x5b   :  { %780 = vmatpush1.bf16.msra.mxu1 %v1912_v4  ;;  %v1915_v6 = vld [vmem:[#allocation8 + $0x3c] ss:$24 sps:$4 sm:$0xff]   ;;  %740 = vmatprep.subr.bf16.mxu0 %v1913_v5  ;;  %v1918_v8 = vld [vmem:[#allocation8 + $0x38] ss:$24 sps:$4 sm:$0xff]   ;;  %v1921_v10 = vld [vmem:[#allocation8 + $0x6c] ss:$24 sps:$4 sm:$0xff]  }
  0x5c   :  { %781 = vmatprep.subr.bf16.mxu1 %v1915_v6  ;;  %v1923_v11 = vld [vmem:[#allocation8 + $0x60] ss:$24 sps:$4 sm:$0xff]   ;;  %v1925_v13 = vld [vmem:[#allocation8 + $0x94] ss:$24 sps:$4 sm:$0xff]   ;;  %v1929_v15 = vld [vmem:[#allocation8 + $0x90] ss:$24 sps:$4 sm:$0xff]  }
  0x5d   :  { %v1924_v12 = vld [vmem:[#allocation8 + $0x68] ss:$24 sps:$4 sm:$0xff]   ;;  %v1927_v14 = vld [vmem:[#allocation8 + $0x9c] ss:$24 sps:$4 sm:$0xff]   ;;  %v1930_v16 = vld [vmem:[#allocation8 + $0x98] ss:$24 sps:$4 sm:$0xff]  }
  0x5e   :  { %741 = vmatpush1.bf16.msra.mxu0 %v1917_v7  ;;  %v1931_v17 = vld [vmem:[#allocation8 + $0xc4] ss:$24 sps:$4 sm:$0xff]   ;;  %v1935_v19 = vld [vmem:[#allocation8 + $0xc0] ss:$24 sps:$4 sm:$0xff]   ;;  %v1937_v21 = vld [vmem:[#allocation8 + $0xf4] ss:$24 sps:$4 sm:$0xff]  }
  0x5f   :  { %782 = vmatpush1.bf16.msra.mxu1 %v1918_v8  ;;  %742 = vmatprep.subr.bf16.mxu0 %v1919_v9  ;;  %v1933_v18 = vld [vmem:[#allocation8 + $0xcc] ss:$24 sps:$4 sm:$0xff]   ;;  %v1936_v20 = vld [vmem:[#allocation8 + $0xc8] ss:$24 sps:$4 sm:$0xff]   ;;  %v1939_v22 = vld [vmem:[#allocation8 + $0xfc] ss:$24 sps:$4 sm:$0xff]  }
  0x60   :  { %783 = vmatprep.subr.bf16.mxu1 %v1921_v10  ;;  %v1941_v23 = vld [vmem:[#allocation8 + $0xf0] ss:$24 sps:$4 sm:$0xff]   ;;  %v1943_v25 = vld [vmem:[#allocation8 + $0x124] ss:$24 sps:$4 sm:$0xff]   ;;  %v1947_v27 = vld [vmem:[#allocation8 + $0x120] ss:$24 sps:$4 sm:$0xff]  }
  0x61   :  { %v1942_v24 = vld [vmem:[#allocation8 + $0xf8] ss:$24 sps:$4 sm:$0xff]   ;;  %v1945_v26 = vld [vmem:[#allocation8 + $0x12c] ss:$24 sps:$4 sm:$0xff]   ;;  %v1948_v28 = vld [vmem:[#allocation8 + $0x128] ss:$24 sps:$4 sm:$0xff]  }
  0x62   :  { %743 = vmatpush1.bf16.msra.mxu0 %v1923_v11  ;;  %v1949_v29 = vld [vmem:[#allocation8 + $0x154] ss:$24 sps:$4 sm:$0xff]   ;;  %v1953_v31 = vld [vmem:[#allocation8 + $0x150] ss:$24 sps:$4 sm:$0xff]   ;;  %v1955_v33 = vld [vmem:[#allocation8 + $0x184] ss:$24 sps:$4 sm:$0xff]  }
  0x63   :  { %784 = vmatpush1.bf16.msra.mxu1 %v1924_v12  ;;  %744 = vmatprep.subr.bf16.mxu0 %v1925_v13  ;;  %v1951_v30 = vld [vmem:[#allocation8 + $0x15c] ss:$24 sps:$4 sm:$0xff]   ;;  %v1954_v32 = vld [vmem:[#allocation8 + $0x158] ss:$24 sps:$4 sm:$0xff]   ;;  %v1957_v34 = vld [vmem:[#allocation8 + $0x18c] ss:$24 sps:$4 sm:$0xff]  }
  0x64   :  { %785 = vmatprep.subr.bf16.mxu1 %v1927_v14  ;;  %s2489_s10 = sld [smem:[#allocation3 + $0x2]]  ;;  %s2491_s11 = sld [smem:[#allocation3 + $0x3]]  ;;  %v1959_v35 = vld [vmem:[#allocation8 + $0x180] ss:$24 sps:$4 sm:$0xff]   ;;  %v1961_v37 = vld [vmem:[#allocation8 + $0x1b4] ss:$24 sps:$4 sm:$0xff]  }
  0x65   :  { %s2493_s12 = sld [smem:[#allocation3 + $0x4]]  ;;  %v1960_v36 = vld [vmem:[#allocation8 + $0x188] ss:$24 sps:$4 sm:$0xff]   ;;  %s2495_s13 = sld [smem:[#allocation3 + $0x5]]  ;;  %v1963_v38 = vld [vmem:[#allocation8 + $0x1bc] ss:$24 sps:$4 sm:$0xff]  }
  0x66   :  { %745 = vmatpush1.bf16.msra.mxu0 %v1929_v15  ;;  %s2497_s14 = sld [smem:[#allocation3 + $0x6]]  ;;  %s2499_s15 = sld [smem:[#allocation3 + $0x7]]  ;;  %v1965_v39 = vld [vmem:[#allocation8 + $0x1b0] ss:$24 sps:$4 sm:$0xff]   ;;  %v1967_v41 = vld [vmem:[#allocation8 + $0x1e4] ss:$24 sps:$4 sm:$0xff]  }
  0x67   :  { %786 = vmatpush1.bf16.msra.mxu1 %v1930_v16  ;;  %746 = vmatprep.subr.bf16.mxu0 %v1931_v17  ;;  %v1966_v40 = vld [vmem:[#allocation8 + $0x1b8] ss:$24 sps:$4 sm:$0xff]   ;;  %v1969_v42 = vld [vmem:[#allocation8 + $0x1ec] ss:$24 sps:$4 sm:$0xff]   ;;  %v1972_v44 = vld [vmem:[#allocation8 + $0x1e8] ss:$24 sps:$4 sm:$0xff]  }
  0x68   :  { %787 = vmatprep.subr.bf16.mxu1 %v1933_v18  ;;  %v1971_v43 = vld [vmem:[#allocation8 + $0x1e0] ss:$24 sps:$4 sm:$0xff]   ;;  %v1973_v45 = vld [vmem:[#allocation8 + $0x214] ss:$24 sps:$4 sm:$0xff]   ;;  %v1977_v47 = vld [vmem:[#allocation8 + $0x210] ss:$24 sps:$4 sm:$0xff]  }
  0x69   :  { %v1975_v46 = vld [vmem:[#allocation8 + $0x21c] ss:$24 sps:$4 sm:$0xff]   ;;  %v1978_v48 = vld [vmem:[#allocation8 + $0x218] ss:$24 sps:$4 sm:$0xff]   ;;  %s93_s16 = scalar_lea.vmem [#allocation7], %s2485_s4  ;;  %s97_s17 = scalar_lea.vmem [#allocation7], %s2487_s9 }
  0x6a   :  { %747 = vmatpush1.bf16.msra.mxu0 %v1935_v19  ;;  %v94_v49 = vld [vmem:[%s93_s16] sm:$0x1]  ;;  %v1979_v50 = vld [vmem:[#allocation8 + $0x244] ss:$24 sps:$4 sm:$0xff]   ;;  %s101_s18 = scalar_lea.vmem [#allocation7], %s2489_s10  ;;  %s105_s1 = scalar_lea.vmem [#allocation7], %s2491_s11 }
  0x6b   :  { %788 = vmatpush1.bf16.msra.mxu1 %v1936_v20  ;;  %748 = vmatprep.subr.bf16.mxu0 %v1937_v21  ;;  %v1981_v51 = vld [vmem:[#allocation8 + $0x24c] ss:$24 sps:$4 sm:$0xff]   ;;  %95 = vst [vmem:[#allocation2] sm:$0x1] %v94_v49  ;;  %v98_v52 = vld [vmem:[%s97_s17] sm:$0x1] }
  0x6c   :  { %789 = vmatprep.subr.bf16.mxu1 %v1939_v22  ;;  %v102_v53 = vld [vmem:[%s101_s18] sm:$0x1]  ;;  %99 = vst [vmem:[#allocation2 + $0x1] sm:$0x1] %v98_v52  ;;  %s109_s19 = scalar_lea.vmem [#allocation7], %s2493_s12  ;;  %s113_s20 = scalar_lea.vmem [#allocation7], %s2495_s13 }
  0x6d   :  { %v106_v54 = vld [vmem:[%s105_s1] sm:$0x1]  ;;  %103 = vst [vmem:[#allocation2 + $0x2] sm:$0x1] %v102_v53  ;;  %s117_s2 = scalar_lea.vmem [#allocation7], %s2497_s14  ;;  %s121_s21 = scalar_lea.vmem [#allocation7], %s2499_s15 }
  0x6e   :  { %749 = vmatpush1.bf16.msra.mxu0 %v1941_v23  ;;  %107 = vst [vmem:[#allocation2 + $0x3] sm:$0x1] %v106_v54  ;;  %v110_v55 = vld [vmem:[%s109_s19] sm:$0x1]  ;;  %v2509_v59 = vld [vmem:[#allocation11] sm:$0xff]  ;;  %v2511_v60 = vld [vmem:[#allocation11 + $0x8] sm:$0xff] }
  0x6f   :  { %790 = vmatpush1.bf16.msra.mxu1 %v1942_v24  ;;  %750 = vmatprep.subr.bf16.mxu0 %v1943_v25  ;;  %v114_v56 = vld [vmem:[%s113_s20] sm:$0x1]  ;;  %111 = vst [vmem:[#allocation2 + $0x4] sm:$0x1] %v110_v55  ;;  %v129_v61 = vpack.c.bf16 %v2509_v59, %v2509_v59  ;;  %886 = vst [vmem:[#allocation2 + $0x8] sm:$0xff] %v2511_v60  ;;  %s2382_s22 = smov [#allocation13]  }
  0x70   :  { %791 = vmatprep.subr.bf16.mxu1 %v1945_v26  ;;  %v118_v57 = vld [vmem:[%s117_s2] sm:$0x1]  ;;  %115 = vst [vmem:[#allocation2 + $0x5] sm:$0x1] %v114_v56  ;;  %v1985_v0 = vld [vmem:[#allocation8 + $0x274] ss:$24 sps:$4 sm:$0xff]  }
  0x71   :  { %119 = vst [vmem:[#allocation2 + $0x6] sm:$0x1] %v118_v57  ;;  %v122_v58 = vld [vmem:[%s121_s21] sm:$0x1]  ;;  %v1987_v1 = vld [vmem:[#allocation8 + $0x27c] ss:$24 sps:$4 sm:$0xff]   ;;  %770 = vmatprep.mubr.bf16.mxu0 %v129_v61  ;;  %811 = vmatprep.mubr.bf16.mxu1 %v129_v61 }
  0x72   :  { %751 = vmatpush1.bf16.msra.mxu0 %v1947_v27  ;;  %123 = vst [vmem:[#allocation2 + $0x7] sm:$0x1] %v122_v58  ;;  %v1983_v62 = vld [vmem:[#allocation8 + $0x240] ss:$24 sps:$4 sm:$0xff]   ;;  %v1989_v2 = vld [vmem:[#allocation8 + $0x270] ss:$24 sps:$4 sm:$0xff]  }
  0x73   :  { %792 = vmatpush1.bf16.msra.mxu1 %v1948_v28  ;;  %752 = vmatprep.subr.bf16.mxu0 %v1949_v29  ;;  %v1984_v63 = vld [vmem:[#allocation8 + $0x248] ss:$24 sps:$4 sm:$0xff]   ;;  %v1990_v3 = vld [vmem:[#allocation8 + $0x278] ss:$24 sps:$4 sm:$0xff]   ;;  %v1991_v4 = vld [vmem:[#allocation8 + $0x2a4] ss:$24 sps:$4 sm:$0xff]  }
  0x74   :  { %793 = vmatprep.subr.bf16.mxu1 %v1951_v30  ;;  %v1993_v5 = vld [vmem:[#allocation8 + $0x2ac] ss:$24 sps:$4 sm:$0xff]   ;;  %v1995_v6 = vld [vmem:[#allocation8 + $0x2a0] ss:$24 sps:$4 sm:$0xff]   ;;  %v1999_v9 = vld [vmem:[#allocation8 + $0x2dc] ss:$24 sps:$4 sm:$0xff]  }
  0x75   :  { %v1996_v7 = vld [vmem:[#allocation8 + $0x2a8] ss:$24 sps:$4 sm:$0xff]   ;;  %v1997_v8 = vld [vmem:[#allocation8 + $0x2d4] ss:$24 sps:$4 sm:$0xff]   ;;  %v2002_v11 = vld [vmem:[#allocation8 + $0x2d8] ss:$24 sps:$4 sm:$0xff]  }
  0x76   :  { %753 = vmatpush1.bf16.msra.mxu0 %v1953_v31  ;;  %v2001_v10 = vld [vmem:[#allocation8 + $0x2d0] ss:$24 sps:$4 sm:$0xff]   ;;  %v2005_v13 = vld [vmem:[#allocation8 + $0x14] ss:$24 sps:$4 sm:$0xff]   ;;  %v2008_v16 = vld [vmem:[#allocation8 + $0x44] ss:$24 sps:$4 sm:$0xff]  }
  0x77   :  { %794 = vmatpush1.bf16.msra.mxu1 %v1954_v32  ;;  %754 = vmatprep.subr.bf16.mxu0 %v1955_v33  ;;  %v2003_v15 = vld [vmem:[#allocation8 + $0x10] ss:$24 sps:$4 sm:$0xff]   ;;  %v2006_v17 = vld [vmem:[#allocation8 + $0x40] ss:$24 sps:$4 sm:$0xff]   ;;  %v2011_v18 = vld [vmem:[#allocation8 + $0x74] ss:$24 sps:$4 sm:$0xff]  }
  0x78   :  { %795 = vmatprep.subr.bf16.mxu1 %v1957_v34  ;;  %v2009_v19 = vld [vmem:[#allocation8 + $0x70] ss:$24 sps:$4 sm:$0xff]   ;;  %v2014_v20 = vld [vmem:[#allocation8 + $0xa4] ss:$24 sps:$4 sm:$0xff]   ;;  %v2012_v21 = vld [vmem:[#allocation8 + $0xa0] ss:$24 sps:$4 sm:$0xff]  }
  0x79   :  { %v126_v12 = vld [vmem:[#allocation2] sm:$0xff]  ;;  %v2017_v22 = vld [vmem:[#allocation8 + $0xd4] ss:$24 sps:$4 sm:$0xff]   ;;  %v2015_v23 = vld [vmem:[#allocation8 + $0xd0] ss:$24 sps:$4 sm:$0xff]   ;;  %s1654_s23 = sshll.u32 %s2382_s22, 4  ;;  %s1655_s23 = int_to_ptr.vmem [resolvable:$true] %s1654_s23 }
  0x7a   :  { %755 = vmatpush1.bf16.msra.mxu0 %v1959_v35  ;;  %v2516_v14 = vpack.c.bf16 %v126_v12, %v126_v12  ;;  %v2020_v24 = vld [vmem:[#allocation8 + $0x104] ss:$24 sps:$4 sm:$0xff]   ;;  %v2018_v25 = vld [vmem:[#allocation8 + $0x100] ss:$24 sps:$4 sm:$0xff]   ;;  %v2023_v26 = vld [vmem:[#allocation8 + $0x134] ss:$24 sps:$4 sm:$0xff]   ;;  %p2319_p8 = scmp.lt.s32.totalorder %s1655_s23, %s1655_s23 }
  0x7b   :  { %796 = vmatpush1.bf16.msra.mxu1 %v1960_v36  ;;  %756 = vmatprep.subr.bf16.mxu0 %v1961_v37  ;;  %v2021_v27 = vld [vmem:[#allocation8 + $0x130] ss:$24 sps:$4 sm:$0xff]   ;;  %v2026_v28 = vld [vmem:[#allocation8 + $0x164] ss:$24 sps:$4 sm:$0xff]   ;;  %v2024_v29 = vld [vmem:[#allocation8 + $0x160] ss:$24 sps:$4 sm:$0xff]  }
  0x7c   :  { %797 = vmatprep.subr.bf16.mxu1 %v1963_v38  ;;  %v2029_v30 = vld [vmem:[#allocation8 + $0x194] ss:$24 sps:$4 sm:$0xff]   ;;  %v2027_v31 = vld [vmem:[#allocation8 + $0x190] ss:$24 sps:$4 sm:$0xff]   ;;  %v2032_v32 = vld [vmem:[#allocation8 + $0x1c4] ss:$24 sps:$4 sm:$0xff]  }
  0x7d   :  { %v2030_v33 = vld [vmem:[#allocation8 + $0x1c0] ss:$24 sps:$4 sm:$0xff]   ;;  %v2035_v34 = vld [vmem:[#allocation8 + $0x1f4] ss:$24 sps:$4 sm:$0xff]   ;;  %v2033_v35 = vld [vmem:[#allocation8 + $0x1f0] ss:$24 sps:$4 sm:$0xff]  }
  0x7e   :  { %757 = vmatpush1.bf16.msra.mxu0 %v1965_v39  ;;  %v2038_v36 = vld [vmem:[#allocation8 + $0x224] ss:$24 sps:$4 sm:$0xff]   ;;  %v2036_v37 = vld [vmem:[#allocation8 + $0x220] ss:$24 sps:$4 sm:$0xff]   ;;  %v2041_v38 = vld [vmem:[#allocation8 + $0x254] ss:$24 sps:$4 sm:$0xff]  }
  0x7f   :  { %798 = vmatpush1.bf16.msra.mxu1 %v1966_v40  ;;  %758 = vmatprep.subr.bf16.mxu0 %v1967_v41  ;;  %v2039_v39 = vld [vmem:[#allocation8 + $0x250] ss:$24 sps:$4 sm:$0xff]   ;;  %v2044_v40 = vld [vmem:[#allocation8 + $0x284] ss:$24 sps:$4 sm:$0xff]   ;;  %v2042_v41 = vld [vmem:[#allocation8 + $0x280] ss:$24 sps:$4 sm:$0xff]  }
  0x80   :  { %799 = vmatprep.subr.bf16.mxu1 %v1969_v42  ;;  %v2047_v42 = vld [vmem:[#allocation8 + $0x2b4] ss:$24 sps:$4 sm:$0xff]   ;;  %v2057_v52 = vld [vmem:[#allocation8 + $0x330] ss:$24 sps:$4 sm:$0xff]   ;;  %v2065_v54 = vld [vmem:[#allocation8 + $0x364] ss:$24 sps:$4 sm:$0xff]  }
  0x81   :  { %v2056_v49 = vld [vmem:[#allocation8 + $0x30c] ss:$24 sps:$4 sm:$0xff]   ;;  %v2060_v53 = vld [vmem:[#allocation8 + $0x338] ss:$24 sps:$4 sm:$0xff]   ;;  %v2066_v57 = vld [vmem:[#allocation8 + $0x368] ss:$24 sps:$4 sm:$0xff]  }
  0x82   :  { %759 = vmatpush1.bf16.msra.mxu0 %v1971_v43  ;;  %v2045_v43 = vld [vmem:[#allocation8 + $0x2b0] ss:$24 sps:$4 sm:$0xff]   ;;  %v2068_v55 = vld [vmem:[#allocation8 + $0x36c] ss:$24 sps:$4 sm:$0xff]   ;;  %v2063_v56 = vld [vmem:[#allocation8 + $0x360] ss:$24 sps:$4 sm:$0xff]  }
  0x83   :  { %800 = vmatpush1.bf16.msra.mxu1 %v1972_v44  ;;  %760 = vmatprep.subr.bf16.mxu0 %v1973_v45  ;;  %v2050_v44 = vld [vmem:[#allocation8 + $0x2e4] ss:$24 sps:$4 sm:$0xff]   ;;  %v2048_v45 = vld [vmem:[#allocation8 + $0x2e0] ss:$24 sps:$4 sm:$0xff]   ;;  %v2071_v58 = vld [vmem:[#allocation8 + $0x394] ss:$24 sps:$4 sm:$0xff]  }
  0x84   :  { %801 = vmatprep.subr.bf16.mxu1 %v1975_v46  ;;  %v2051_v46 = vld [vmem:[#allocation8 + $0x300] ss:$24 sps:$4 sm:$0xff]   ;;  %v2095_v12 = vld [vmem:[#allocation8 + $0x454] ss:$24 sps:$4 sm:$0xff]   ;;  %s2383_s24 = smov [#allocation14]   ;;  %s2314_s26 = scalar_lea.vmem %s1655_s23, 128 }
  0x85   :  { %s1663_s25 = sshll.u32 %s2383_s24, 4  ;;  %p2315_p7 = scmp.ne.s32.totalorder %s1655_s23, %s2314_s26  ;;  %s2566_s25 = int_to_ptr.vmem [resolvable:$true] %s1663_s25 }
  0x86   :  { %761 = vmatpush1.bf16.msra.mxu0 %v1977_v47  ;;  %v2053_v47 = vld [vmem:[#allocation8 + $0x304] ss:$24 sps:$4 sm:$0xff]   ;;  %p2320_p9 = scmp.lt.s32.totalorder %s2314_s26, %s2314_s26 }
  0x87   :  { %802 = vmatpush1.bf16.msra.mxu1 %v1978_v48  ;;  %762 = vmatprep.subr.bf16.mxu0 %v1979_v50  ;;  %v2054_v48 = vld [vmem:[#allocation8 + $0x308] ss:$24 sps:$4 sm:$0xff]   ;;  %v2059_v50 = vld [vmem:[#allocation8 + $0x334] ss:$24 sps:$4 sm:$0xff]  }
  0x88   :  { %803 = vmatprep.subr.bf16.mxu1 %v1981_v51  ;;  %v2062_v51 = vld [vmem:[#allocation8 + $0x33c] ss:$24 sps:$4 sm:$0xff]   ;;  %p2321_p10 = por %p2320_p9, %p2319_p8 }
  0x8a   :  { %763 = vmatpush1.bf16.msra.mxu0 %v1983_v62  ;;  %v2069_v62 = vld [vmem:[#allocation8 + $0x390] ss:$24 sps:$4 sm:$0xff]   ;;  %p2322_p11 = pnand %p2321_p10, %p2315_p7 }
  0x8b   :  { %804 = vmatpush1.bf16.msra.mxu1 %v1984_v63  ;;  %764 = vmatprep.subr.bf16.mxu0 %v1985_v0  ;;  %v2072_v63 = vld [vmem:[#allocation8 + $0x398] ss:$24 sps:$4 sm:$0xff]   ;;  %v2077_v0 = vld [vmem:[#allocation8 + $0x3c4] ss:$24 sps:$4 sm:$0xff]  }
  0x8c   :  { %805 = vmatprep.subr.bf16.mxu1 %v1987_v1  ;;  %v2080_v1 = vld [vmem:[#allocation8 + $0x3cc] ss:$24 sps:$4 sm:$0xff]  }
  0x8e   :  { %765 = vmatpush1.bf16.msra.mxu0 %v1989_v2  ;;  %v2075_v2 = vld [vmem:[#allocation8 + $0x3c0] ss:$24 sps:$4 sm:$0xff]  }
  0x8f   :  { %806 = vmatpush1.bf16.msra.mxu1 %v1990_v3  ;;  %766 = vmatprep.subr.bf16.mxu0 %v1991_v4  ;;  %v2078_v3 = vld [vmem:[#allocation8 + $0x3c8] ss:$24 sps:$4 sm:$0xff]   ;;  %v2083_v4 = vld [vmem:[#allocation8 + $0x3f4] ss:$24 sps:$4 sm:$0xff]  }
  0x90   :  { %807 = vmatprep.subr.bf16.mxu1 %v1993_v5  ;;  %v2081_v5 = vld [vmem:[#allocation8 + $0x3f0] ss:$24 sps:$4 sm:$0xff]  }
  0x92   :  { %767 = vmatpush1.bf16.msra.mxu0 %v1995_v6  ;;  %v2086_v6 = vld [vmem:[#allocation8 + $0x3fc] ss:$24 sps:$4 sm:$0xff]  }
  0x93   :  { %808 = vmatpush1.bf16.msra.mxu1 %v1996_v7  ;;  %768 = vmatprep.subr.bf16.mxu0 %v1997_v8  ;;  %v2084_v7 = vld [vmem:[#allocation8 + $0x3f8] ss:$24 sps:$4 sm:$0xff]   ;;  %v2089_v8 = vld [vmem:[#allocation8 + $0x424] ss:$24 sps:$4 sm:$0xff]  }
  0x94   :  { %809 = vmatprep.subr.bf16.mxu1 %v1999_v9  ;;  %v2087_v9 = vld [vmem:[#allocation8 + $0x420] ss:$24 sps:$4 sm:$0xff]  }
  0x96   :  { %769 = vmatpush1.bf16.msra.mxu0 %v2001_v10  ;;  %v2092_v10 = vld [vmem:[#allocation8 + $0x42c] ss:$24 sps:$4 sm:$0xff]  }
  0x97   :  { %810 = vmatpush1.bf16.msra.mxu1 %v2002_v11  ;;  %820 = vmatprep.subr.bf16.mxu0 %v2005_v13  ;;  %v2090_v11 = vld [vmem:[#allocation8 + $0x428] ss:$24 sps:$4 sm:$0xff]  }
  0x98   :  { %1501 = vmatprep.subr.bf16.mxu1 %v2053_v47  ;;  %v2093_v13 = vld [vmem:[#allocation8 + $0x450] ss:$24 sps:$4 sm:$0xff]  }
  0x99   :  { %771 = vmatmul.mubr.bf16.vlgmr.msra.gmra.mrb[0].mxu0 %v2516_v14  ;;  %v2144_v47 = vld [vmem:[#allocation8 + $0x5d8] ss:$24 sps:$4 sm:$0xff]  }
  0x9a   :  { %812 = vmatmul.mubr.bf16.vlgmr.msra.gmra.mrb[0].mxu1 %v2516_v14  ;;  %821 = vmatpush1.bf16.msra.mxu0 %v2003_v15  ;;  %v2096_v15 = vld [vmem:[#allocation8 + $0x458] ss:$24 sps:$4 sm:$0xff]  }
  0x9b   :  { %852 = vmatprep.mubr.bf16.mxu0 %v129_v61  ;;  %822 = vmatprep.subr.bf16.mxu0 %v2008_v16  ;;  %v2074_v61 = vld [vmem:[#allocation8 + $0x39c] ss:$24 sps:$4 sm:$0xff]  }
  0x9c   :  { %1502 = vmatpush1.bf16.msra.mxu1 %v2051_v46  ;;  %v2101_v16 = vld [vmem:[#allocation8 + $0x484] ss:$24 sps:$4 sm:$0xff]  }
  0x9d   :  { %1503 = vmatprep.subr.bf16.mxu1 %v2059_v50  ;;  %v2146_v46 = vld [vmem:[#allocation8 + $0x5dc] ss:$24 sps:$4 sm:$0xff]   ;;  %v228_v50 = vlaneseq }
  0x9e   :  { %823 = vmatpush1.bf16.msra.mxu0 %v2006_v17  ;;  %v2099_v17 = vld [vmem:[#allocation8 + $0x480] ss:$24 sps:$4 sm:$0xff]  }
  0x9f   :  { %824 = vmatprep.subr.bf16.mxu0 %v2011_v18  ;;  %v2104_v18 = vld [vmem:[#allocation8 + $0x48c] ss:$24 sps:$4 sm:$0xff]  }
  0xa0   :  { %1504 = vmatpush1.bf16.msra.mxu1 %v2057_v52 }
  0xa1   :  { %1505 = vmatprep.subr.bf16.mxu1 %v2065_v54 }
  0xa2   :  { %825 = vmatpush1.bf16.msra.mxu0 %v2009_v19  ;;  %v2102_v19 = vld [vmem:[#allocation8 + $0x488] ss:$24 sps:$4 sm:$0xff]  }
  0xa3   :  { %826 = vmatprep.subr.bf16.mxu0 %v2014_v20  ;;  %v2107_v20 = vld [vmem:[#allocation8 + $0x4b4] ss:$24 sps:$4 sm:$0xff]  }
  0xa4   :  { %1506 = vmatpush1.bf16.msra.mxu1 %v2063_v56 }
  0xa5   :  { %1507 = vmatprep.subr.bf16.mxu1 %v2071_v58 }
  0xa6   :  { %827 = vmatpush1.bf16.msra.mxu0 %v2012_v21  ;;  %v2105_v21 = vld [vmem:[#allocation8 + $0x4b0] ss:$24 sps:$4 sm:$0xff]  }
  0xa7   :  { %828 = vmatprep.subr.bf16.mxu0 %v2017_v22  ;;  %v2110_v22 = vld [vmem:[#allocation8 + $0x4bc] ss:$24 sps:$4 sm:$0xff]  }
  0xa8   :  { %1508 = vmatpush1.bf16.msra.mxu1 %v2069_v62 }
  0xa9   :  { %1509 = vmatprep.subr.bf16.mxu1 %v2077_v0 }
  0xaa   :  { %829 = vmatpush1.bf16.msra.mxu0 %v2015_v23  ;;  %v2108_v23 = vld [vmem:[#allocation8 + $0x4b8] ss:$24 sps:$4 sm:$0xff]  }
  0xab   :  { %830 = vmatprep.subr.bf16.mxu0 %v2020_v24  ;;  %v2113_v24 = vld [vmem:[#allocation8 + $0x4e4] ss:$24 sps:$4 sm:$0xff]  }
  0xac   :  { %1510 = vmatpush1.bf16.msra.mxu1 %v2075_v2 }
  0xad   :  { %1511 = vmatprep.subr.bf16.mxu1 %v2083_v4 }
  0xae   :  { %831 = vmatpush1.bf16.msra.mxu0 %v2018_v25  ;;  %v2111_v25 = vld [vmem:[#allocation8 + $0x4e0] ss:$24 sps:$4 sm:$0xff]  }
  0xaf   :  { %832 = vmatprep.subr.bf16.mxu0 %v2023_v26  ;;  %v2116_v26 = vld [vmem:[#allocation8 + $0x4ec] ss:$24 sps:$4 sm:$0xff]  }
  0xb0   :  { %1512 = vmatpush1.bf16.msra.mxu1 %v2081_v5 }
  0xb1   :  { %1513 = vmatprep.subr.bf16.mxu1 %v2089_v8 }
  0xb2   :  { %833 = vmatpush1.bf16.msra.mxu0 %v2021_v27  ;;  %v2114_v27 = vld [vmem:[#allocation8 + $0x4e8] ss:$24 sps:$4 sm:$0xff]  }
  0xb3   :  { %834 = vmatprep.subr.bf16.mxu0 %v2026_v28  ;;  %v2119_v28 = vld [vmem:[#allocation8 + $0x514] ss:$24 sps:$4 sm:$0xff]  }
  0xb4   :  { %1514 = vmatpush1.bf16.msra.mxu1 %v2087_v9 }
  0xb5   :  { %1515 = vmatprep.subr.bf16.mxu1 %v2095_v12 }
  0xb6   :  { %835 = vmatpush1.bf16.msra.mxu0 %v2024_v29  ;;  %v2117_v29 = vld [vmem:[#allocation8 + $0x510] ss:$24 sps:$4 sm:$0xff]  }
  0xb7   :  { %836 = vmatprep.subr.bf16.mxu0 %v2029_v30  ;;  %v2122_v30 = vld [vmem:[#allocation8 + $0x51c] ss:$24 sps:$4 sm:$0xff]  }
  0xb8   :  { %1516 = vmatpush1.bf16.msra.mxu1 %v2093_v13 }
  0xb9   :  { %1517 = vmatprep.subr.bf16.mxu1 %v2101_v16 }
  0xba   :  { %837 = vmatpush1.bf16.msra.mxu0 %v2027_v31  ;;  %v2120_v31 = vld [vmem:[#allocation8 + $0x518] ss:$24 sps:$4 sm:$0xff]  }
  0xbb   :  { %838 = vmatprep.subr.bf16.mxu0 %v2032_v32  ;;  %v2125_v32 = vld [vmem:[#allocation8 + $0x544] ss:$24 sps:$4 sm:$0xff]  }
  0xbc   :  { %1518 = vmatpush1.bf16.msra.mxu1 %v2099_v17 }
  0xbd   :  { %1519 = vmatprep.subr.bf16.mxu1 %v2107_v20 }
  0xbe   :  { %839 = vmatpush1.bf16.msra.mxu0 %v2030_v33  ;;  %v2123_v33 = vld [vmem:[#allocation8 + $0x540] ss:$24 sps:$4 sm:$0xff]  }
  0xbf   :  { %840 = vmatprep.subr.bf16.mxu0 %v2035_v34  ;;  %v2128_v34 = vld [vmem:[#allocation8 + $0x54c] ss:$24 sps:$4 sm:$0xff]  }
  0xc0   :  { %1520 = vmatpush1.bf16.msra.mxu1 %v2105_v21 }
  0xc1   :  { %1521 = vmatprep.subr.bf16.mxu1 %v2113_v24 }
  0xc2   :  { %841 = vmatpush1.bf16.msra.mxu0 %v2033_v35  ;;  %v2126_v35 = vld [vmem:[#allocation8 + $0x548] ss:$24 sps:$4 sm:$0xff]  }
  0xc3   :  { %842 = vmatprep.subr.bf16.mxu0 %v2038_v36  ;;  %v2131_v36 = vld [vmem:[#allocation8 + $0x574] ss:$24 sps:$4 sm:$0xff]  }
  0xc4   :  { %1522 = vmatpush1.bf16.msra.mxu1 %v2111_v25 }
  0xc5   :  { %1523 = vmatprep.subr.bf16.mxu1 %v2119_v28 }
  0xc6   :  { %843 = vmatpush1.bf16.msra.mxu0 %v2036_v37  ;;  %v2129_v37 = vld [vmem:[#allocation8 + $0x570] ss:$24 sps:$4 sm:$0xff]  }
  0xc7   :  { %844 = vmatprep.subr.bf16.mxu0 %v2041_v38  ;;  %v2134_v38 = vld [vmem:[#allocation8 + $0x57c] ss:$24 sps:$4 sm:$0xff]  }
  0xc8   :  { %1524 = vmatpush1.bf16.msra.mxu1 %v2117_v29 }
  0xc9   :  { %1525 = vmatprep.subr.bf16.mxu1 %v2125_v32 }
  0xca   :  { %845 = vmatpush1.bf16.msra.mxu0 %v2039_v39  ;;  %v2132_v39 = vld [vmem:[#allocation8 + $0x578] ss:$24 sps:$4 sm:$0xff]  }
  0xcb   :  { %846 = vmatprep.subr.bf16.mxu0 %v2044_v40  ;;  %v2137_v40 = vld [vmem:[#allocation8 + $0x5a4] ss:$24 sps:$4 sm:$0xff]  }
  0xcc   :  { %1526 = vmatpush1.bf16.msra.mxu1 %v2123_v33 }
  0xcd   :  { %1527 = vmatprep.subr.bf16.mxu1 %v2131_v36 }
  0xce   :  { %847 = vmatpush1.bf16.msra.mxu0 %v2042_v41  ;;  %v2135_v41 = vld [vmem:[#allocation8 + $0x5a0] ss:$24 sps:$4 sm:$0xff]  }
  0xcf   :  { %848 = vmatprep.subr.bf16.mxu0 %v2047_v42  ;;  %v2140_v42 = vld [vmem:[#allocation8 + $0x5ac] ss:$24 sps:$4 sm:$0xff]  }
  0xd0   :  { %1528 = vmatpush1.bf16.msra.mxu1 %v2129_v37  ;;  %v2147_v37 = vld [vmem:[#allocation8 + $0x310] ss:$24 sps:$4 sm:$0xff]  }
  0xd1   :  { %1529 = vmatprep.subr.bf16.mxu1 %v2137_v40  ;;  %v2150_v40 = vld [vmem:[#allocation8 + $0x340] ss:$24 sps:$4 sm:$0xff]  }
  0xd2   :  { %849 = vmatpush1.bf16.msra.mxu0 %v2045_v43  ;;  %v2138_v43 = vld [vmem:[#allocation8 + $0x5a8] ss:$24 sps:$4 sm:$0xff]  }
  0xd3   :  { %850 = vmatprep.subr.bf16.mxu0 %v2050_v44  ;;  %v2143_v44 = vld [vmem:[#allocation8 + $0x5d4] ss:$24 sps:$4 sm:$0xff]  }
  0xd4   :  { %1530 = vmatpush1.bf16.msra.mxu1 %v2135_v41  ;;  %v2155_v41 = vld [vmem:[#allocation8 + $0x374] ss:$24 sps:$4 sm:$0xff]  }
  0xd5   :  { %1531 = vmatprep.subr.bf16.mxu1 %v2143_v44  ;;  %v2161_v44 = vld [vmem:[#allocation8 + $0x3d4] ss:$24 sps:$4 sm:$0xff]  }
  0xd6   :  { %851 = vmatpush1.bf16.msra.mxu0 %v2048_v45  ;;  %v2141_v45 = vld [vmem:[#allocation8 + $0x5d0] ss:$24 sps:$4 sm:$0xff]  }
  0xd7   :  { %1542 = vmatprep.subr.bf16.mxu0 %v2056_v49  ;;  %v2149_v49 = vld [vmem:[#allocation8 + $0x314] ss:$24 sps:$4 sm:$0xff]  }
  0xd8   :  { %1532 = vmatpush1.bf16.msra.mxu1 %v2141_v45  ;;  %v2159_v45 = vld [vmem:[#allocation8 + $0x3d0] ss:$24 sps:$4 sm:$0xff]  }
  0xd9   :  { %853 = vmatmul.mubr.bf16.vlgmr.msra.gmra.mrb[4].mxu0 %v2516_v14  ;;  %v2098_v14 = vld [vmem:[#allocation8 + $0x45c] ss:$24 sps:$4 sm:$0xff]   ;;  %1583 = vmatprep.subr.bf16.mxu1 %v2149_v49 }
  0xda   :  { %1543 = vmatpush1.bf16.msra.mxu0 %v2054_v48  ;;  %v2523_v48 = vpack.c.bf16 %v2511_v60, %v2511_v60  ;;  %v2167_v49 = vld [vmem:[#allocation8 + $0x434] ss:$24 sps:$4 sm:$0xff]  }
  0xdb   :  { %1544 = vmatprep.subr.bf16.mxu0 %v2062_v51  ;;  %v2527_v51 = vshrl.u32 %v228_v50, 7  ;;  %v2170_v50 = vld [vmem:[#allocation8 + $0x464] ss:$24 sps:$4 sm:$0xff]  }
  0xdc   :  { %1533 = vmatprep.mubr.bf16.mxu1 %v2523_v48  ;;  %1574 = vmatprep.mubr.bf16.mxu0 %v2523_v48 }
  0xdd   :  { %v230_v52 = vsub.s32 0, %v2527_v51  ;;  %v242_v54 = vsub.s32 3, %v2527_v51  ;;  %v234_v8 = vsub.s32 1, %v2527_v51  ;;  %v246_v9 = vsub.s32 4, %v2527_v51 }
  0xde   :  { %1545 = vmatpush1.bf16.msra.mxu0 %v2060_v53  ;;  %v226_v53 = vld [vmem:[#allocation10] sm:$0x3f] }
  0xdf   :  { %1546 = vmatprep.subr.bf16.mxu0 %v2068_v55  ;;  %v231_v55 = vrot.slane %v226_v53, %v230_v52  ;;  %v243_v60 = vrot.slane %v226_v53, %v242_v54  ;;  %v235_v12 = vrot.slane %v226_v53, %v234_v8  ;;  %v247_v13 = vrot.slane %v226_v53, %v246_v9 }
  0xe2   :  { %1547 = vmatpush1.bf16.msra.mxu0 %v2066_v57 }
  0xe3   :  { %1548 = vmatprep.subr.bf16.mxu0 %v2074_v61 }
  0xe6   :  { %1549 = vmatpush1.bf16.msra.mxu0 %v2072_v63 }
  0xe7   :  { %1550 = vmatprep.subr.bf16.mxu0 %v2080_v1 }
  0xea   :  { %1551 = vmatpush1.bf16.msra.mxu0 %v2078_v3 }
  0xeb   :  { %1552 = vmatprep.subr.bf16.mxu0 %v2086_v6 }
  0xee   :  { %1553 = vmatpush1.bf16.msra.mxu0 %v2084_v7 }
  0xef   :  { %1554 = vmatprep.subr.bf16.mxu0 %v2092_v10  ;;  %v250_v10 = vsub.s32 5, %v2527_v51 }
  0xf2   :  { %1555 = vmatpush1.bf16.msra.mxu0 %v2090_v11  ;;  %v238_v11 = vsub.s32 2, %v2527_v51 }
  0xf3   :  { %1556 = vmatprep.subr.bf16.mxu0 %v2098_v14  ;;  %v251_v14 = vrot.slane %v226_v53, %v250_v10 }
  0xf6   :  { %1557 = vmatpush1.bf16.msra.mxu0 %v2096_v15  ;;  %v239_v15 = vrot.slane %v226_v53, %v238_v11  ;;  %v2168_v53 = vld [vmem:[#allocation8 + $0x460] ss:$24 sps:$4 sm:$0xff]  }
  0xf7   :  { %1558 = vmatprep.subr.bf16.mxu0 %v2104_v18 }
  0xfa   :  { %1559 = vmatpush1.bf16.msra.mxu0 %v2102_v19 }
  0xfb   :  { %1560 = vmatprep.subr.bf16.mxu0 %v2110_v22 }
  0xfe   :  { %1561 = vmatpush1.bf16.msra.mxu0 %v2108_v23 }
  0xff   :  { %1562 = vmatprep.subr.bf16.mxu0 %v2116_v26 }
 0x102   :  { %1563 = vmatpush1.bf16.msra.mxu0 %v2114_v27 }
 0x103   :  { %1564 = vmatprep.subr.bf16.mxu0 %v2122_v30 }
 0x106   :  { %1565 = vmatpush1.bf16.msra.mxu0 %v2120_v31 }
 0x107   :  { %1566 = vmatprep.subr.bf16.mxu0 %v2128_v34 }
 0x10a   :  { %1567 = vmatpush1.bf16.msra.mxu0 %v2126_v35 }
 0x10b   :  { %1568 = vmatprep.subr.bf16.mxu0 %v2134_v38 }
 0x10e   :  { %1569 = vmatpush1.bf16.msra.mxu0 %v2132_v39  ;;  %v2152_v39 = vld [vmem:[#allocation8 + $0x344] ss:$24 sps:$4 sm:$0xff]  }
 0x10f   :  { %1570 = vmatprep.subr.bf16.mxu0 %v2140_v42  ;;  %v2158_v42 = vld [vmem:[#allocation8 + $0x3a4] ss:$24 sps:$4 sm:$0xff]  }
 0x112   :  { %1571 = vmatpush1.bf16.msra.mxu0 %v2138_v43  ;;  %v2156_v43 = vld [vmem:[#allocation8 + $0x3a0] ss:$24 sps:$4 sm:$0xff]  }
 0x113   :  { %1572 = vmatprep.subr.bf16.mxu0 %v2146_v46  ;;  %v2164_v46 = vld [vmem:[#allocation8 + $0x404] ss:$24 sps:$4 sm:$0xff]  }
 0x116   :  { %1573 = vmatpush1.bf16.msra.mxu0 %v2144_v47  ;;  %v2162_v47 = vld [vmem:[#allocation8 + $0x400] ss:$24 sps:$4 sm:$0xff]  }
 0x16c   :  { %v772_v56 = vpop.f32.mrb[0].mxu0 }
 0x16d   :  { %v813_v57 = vpop.f32.mrb[0].mxu1  ;;  %v773_v58 = vadd.f32 %v772_v56, %v231_v55  ;;  %v774_v61 = vpop.f32.mrb[1].mxu0  ;;  %v2173_v55 = vld [vmem:[#allocation8 + $0x494] ss:$24 sps:$4 sm:$0xff]   ;;  %v2176_v56 = vld [vmem:[#allocation8 + $0x4c4] ss:$24 sps:$4 sm:$0xff]  }
 0x16e   :  { %v815_v62 = vpop.f32.mrb[1].mxu1  ;;  %v776_v0 = vpop.f32.mrb[2].mxu0  ;;  %v775_v17 = vadd.f32 %v774_v61, %v235_v12  ;;  %v814_v25 = vadd.f32 %v813_v57, %v239_v15  ;;  %v2174_v57 = vld [vmem:[#allocation8 + $0x4c0] ss:$24 sps:$4 sm:$0xff]   ;;  %v2177_v61 = vld [vmem:[#allocation8 + $0x4f0] ss:$24 sps:$4 sm:$0xff]  }
 0x16f   :  { %v816_v63 = vadd.f32 %v815_v62, %v243_v60  ;;  %v817_v1 = vpop.f32.mrb[2].mxu1  ;;  %v777_v2 = vpop.f32.mrb[3].mxu0  ;;  %v2171_v60 = vld [vmem:[#allocation8 + $0x490] ss:$24 sps:$4 sm:$0xff]   ;;  %v2182_v62 = vld [vmem:[#allocation8 + $0x524] ss:$24 sps:$4 sm:$0xff]  }
 0x170   :  { %v818_v3 = vpop.f32.mrb[3].mxu1  ;;  %v2185_v0 = vld [vmem:[#allocation8 + $0x554] ss:$24 sps:$4 sm:$0xff]   ;;  %v2183_v1 = vld [vmem:[#allocation8 + $0x550] ss:$24 sps:$4 sm:$0xff]  }
 0x171   :  { %v861_v4 = vadd.f32 %v816_v63, %v773_v58  ;;  %v2179_v58 = vld [vmem:[#allocation8 + $0x4f4] ss:$24 sps:$4 sm:$0xff]   ;;  %v2180_v63 = vld [vmem:[#allocation8 + $0x520] ss:$24 sps:$4 sm:$0xff]   ;;  %v2188_v2 = vld [vmem:[#allocation8 + $0x584] ss:$24 sps:$4 sm:$0xff]  }
 0x172   :  { %v2186_v3 = vld [vmem:[#allocation8 + $0x580] ss:$24 sps:$4 sm:$0xff]   ;;  %v989_v12 = vld [vmem:[#allocation10 + $0x6] sm:$0x3f] }
 0x173   :  { %v1793_v5 = vmul.f32 -1.442695, %v861_v4  ;;  %v2191_v4 = vld [vmem:[#allocation8 + $0x5b4] ss:$24 sps:$4 sm:$0xff]  }
 0x175   :  { %2195 = vpow2.f32 %v1793_v5  ;;  %v2189_v5 = vld [vmem:[#allocation8 + $0x5b0] ss:$24 sps:$4 sm:$0xff]  }
 0x17f   :  { %v2196_v6 = vpop.eup %2195 }
 0x180   :  { %v865_v7 = vadd.f32 1.0, %v2196_v6  ;;  %v2194_v6 = vld [vmem:[#allocation8 + $0x5e4] ss:$24 sps:$4 sm:$0xff]  }
 0x182   :  { %2197 = vrcp.f32 %v865_v7  ;;  %v2192_v7 = vld [vmem:[#allocation8 + $0x5e0] ss:$24 sps:$4 sm:$0xff]  }
 0x18c   :  { %v2198_v22 = vpop.eup %2197 }
 0x1ac   :  { %v854_v16 = vpop.f32.mrb[4].mxu0 }
 0x1ad   :  { %v855_v18 = vadd.f32 %v854_v16, %v247_v13  ;;  %v856_v19 = vpop.f32.mrb[5].mxu0  ;;  %v994_v13 = vrot.slane %v989_v12, %v230_v52  ;;  %v998_v52 = vrot.slane %v989_v12, %v234_v8 }
 0x1ae   :  { %v857_v20 = vadd.f32 %v856_v19, %v251_v14  ;;  %v858_v21 = vpop.f32.mrb[6].mxu0  ;;  %v1006_v14 = vrot.slane %v989_v12, %v242_v54  ;;  %v1010_v54 = vrot.slane %v989_v12, %v246_v9 }
 0x1af   :  { %v868_v23 = vadd.f32 %v855_v18, %v775_v17  ;;  %v859_v24 = vpop.f32.mrb[7].mxu0 }
 0x1b0   :  { %v875_v26 = vmul.f32 %v2198_v22, %v857_v20 }
 0x1b1   :  { %v1794_v27 = vmul.f32 -1.442695, %v868_v23 }
 0x1b2   :  { %v876_v28 = vadd.f32 %v875_v26, %v814_v25 }
 0x1b3   :  { %2199 = vpow2.f32 %v1794_v27 }
 0x1bd   :  { %v2200_v29 = vpop.eup %2199 }
 0x1be   :  { %v872_v30 = vadd.f32 1.0, %v2200_v29  ;;  %v1014_v29 = vrot.slane %v989_v12, %v250_v10 }
 0x1c0   :  { %2201 = vrcp.f32 %v872_v30  ;;  %v1002_v30 = vrot.slane %v989_v12, %v238_v11 }
 0x1c1   :  { %2203 = vtanh.f32 %v876_v28 }
 0x1ca   :  { %v2202_v31 = vpop.eup %2201 }
 0x1cb   :  { %v878_v32 = vsub.f32 1.0, %v2202_v31  ;;  %v2204_v33 = vpop.eup %2203  ;;  %v880_v34 = vmul.f32 %v2202_v31, %v2509_v59  ;;  %v2153_v59 = vld [vmem:[#allocation8 + $0x370] ss:$24 sps:$4 sm:$0xff]  }
 0x1cd   :  { %v879_v35 = vmul.f32 %v2204_v33, %v878_v32 }
 0x1cf   :  { %v881_v36 = vadd.f32 %v880_v34, %v879_v35 }
 0x1d1   :  { %882 = vst [vmem:[#allocation14] sm:$0xff] %v881_v36  ;;  %883 = vst [vmem:[#allocation2] sm:$0xff] %v881_v36  ;;  %v2548_v38 = vpack.c.bf16 %v881_v36, %v881_v36 }
 0x1d3   :  { %1534 = vmatmul.mubr.bf16.vlgmr.msra.gmra.mrb[4].mxu1 %v2548_v38  ;;  %1575 = vmatmul.mubr.bf16.vlgmr.msra.gmra.mrb[8].mxu0 %v2548_v38 }
 0x1d4   :  { %1584 = vmatpush1.bf16.msra.mxu1 %v2147_v37  ;;  %1615 = vmatprep.mubr.bf16.mxu1 %v2523_v48  ;;  %v2165_v48 = vld [vmem:[#allocation8 + $0x430] ss:$24 sps:$4 sm:$0xff]  }
 0x1d5   :  { %1585 = vmatprep.subr.bf16.mxu1 %v2152_v39 }
 0x1d8   :  { %1586 = vmatpush1.bf16.msra.mxu1 %v2150_v40 }
 0x1d9   :  { %1587 = vmatprep.subr.bf16.mxu1 %v2155_v41 }
 0x1dc   :  { %1588 = vmatpush1.bf16.msra.mxu1 %v2153_v59 }
 0x1dd   :  { %1589 = vmatprep.subr.bf16.mxu1 %v2158_v42 }
 0x1e0   :  { %1590 = vmatpush1.bf16.msra.mxu1 %v2156_v43 }
 0x1e1   :  { %1591 = vmatprep.subr.bf16.mxu1 %v2161_v44  ;;  %v2215_v44 = vld [vmem:[#allocation2 + $0x8] sm:$0xff] }
 0x1e4   :  { %1592 = vmatpush1.bf16.msra.mxu1 %v2159_v45 }
 0x1e5   :  { %1593 = vmatprep.subr.bf16.mxu1 %v2164_v46 }
 0x1e8   :  { %1594 = vmatpush1.bf16.msra.mxu1 %v2162_v47 }
 0x1e9   :  { %1595 = vmatprep.subr.bf16.mxu1 %v2167_v49 }
 0x1ec   :  { %1596 = vmatpush1.bf16.msra.mxu1 %v2165_v48 }
 0x1ed   :  { %1597 = vmatprep.subr.bf16.mxu1 %v2170_v50 }
 0x1f0   :  { %1598 = vmatpush1.bf16.msra.mxu1 %v2168_v53 }
 0x1f1   :  { %1599 = vmatprep.subr.bf16.mxu1 %v2173_v55 }
 0x1f4   :  { %1600 = vmatpush1.bf16.msra.mxu1 %v2171_v60 }
 0x1f5   :  { %1601 = vmatprep.subr.bf16.mxu1 %v2176_v56 }
 0x1f8   :  { %1602 = vmatpush1.bf16.msra.mxu1 %v2174_v57 }
 0x1f9   :  { %1603 = vmatprep.subr.bf16.mxu1 %v2179_v58 }
 0x1fc   :  { %1604 = vmatpush1.bf16.msra.mxu1 %v2177_v61 }
 0x1fd   :  { %1605 = vmatprep.subr.bf16.mxu1 %v2182_v62 }
 0x200   :  { %1606 = vmatpush1.bf16.msra.mxu1 %v2180_v63 }
 0x201   :  { %1607 = vmatprep.subr.bf16.mxu1 %v2185_v0 }
 0x204   :  { %1608 = vmatpush1.bf16.msra.mxu1 %v2183_v1 }
 0x205   :  { %1609 = vmatprep.subr.bf16.mxu1 %v2188_v2 }
 0x208   :  { %1610 = vmatpush1.bf16.msra.mxu1 %v2186_v3 }
 0x209   :  { %1611 = vmatprep.subr.bf16.mxu1 %v2191_v4 }
 0x20c   :  { %1612 = vmatpush1.bf16.msra.mxu1 %v2189_v5 }
 0x20d   :  { %1613 = vmatprep.subr.bf16.mxu1 %v2194_v6 }
 0x210   :  { %1614 = vmatpush1.bf16.msra.mxu1 %v2192_v7 }
 0x213   :  { %1616 = vmatmul.mubr.bf16.vlgmr.msra.gmra.mrb[8].mxu1 %v2548_v38 }
 0x2a6   :  { %v1535_v15 = vpop.f32.mrb[4].mxu1  ;;  %v1576_v16 = vpop.f32.mrb[8].mxu0 }
 0x2a7   :  { %v1536_v17 = vadd.f32 %v1535_v15, %v994_v13  ;;  %v1537_v18 = vpop.f32.mrb[5].mxu1  ;;  %v1578_v19 = vpop.f32.mrb[9].mxu0  ;;  %v1577_v40 = vadd.f32 %v1576_v16, %v1002_v30 }
 0x2a8   :  { %v1579_v20 = vadd.f32 %v1578_v19, %v1006_v14  ;;  %v1539_v21 = vpop.f32.mrb[6].mxu1  ;;  %v1580_v22 = vpop.f32.mrb[10].mxu0  ;;  %v1538_v32 = vadd.f32 %v1537_v18, %v998_v52 }
 0x2a9   :  { %v1540_v23 = vpop.f32.mrb[7].mxu1  ;;  %v1581_v24 = vpop.f32.mrb[11].mxu0 }
 0x2aa   :  { %v1624_v25 = vadd.f32 %v1579_v20, %v1536_v17 }
 0x2ac   :  { %v1891_v26 = vmul.f32 -1.442695, %v1624_v25 }
 0x2ae   :  { %2205 = vpow2.f32 %v1891_v26 }
 0x2b8   :  { %v2206_v27 = vpop.eup %2205 }
 0x2b9   :  { %v1628_v28 = vadd.f32 1.0, %v2206_v27 }
 0x2bb   :  { %2207 = vrcp.f32 %v1628_v28 }
 0x2c5   :  { %v2208_v37 = vpop.eup %2207 }
 0x2e6   :  { %v1617_v31 = vpop.f32.mrb[8].mxu1 }
 0x2e7   :  { %v1618_v33 = vadd.f32 %v1617_v31, %v1010_v54  ;;  %v1619_v34 = vpop.f32.mrb[9].mxu1 }
 0x2e8   :  { %v1620_v35 = vadd.f32 %v1619_v34, %v1014_v29  ;;  %v1621_v36 = vpop.f32.mrb[10].mxu1 }
 0x2e9   :  { %v1631_v38 = vadd.f32 %v1618_v33, %v1538_v32  ;;  %v1622_v39 = vpop.f32.mrb[11].mxu1 }
 0x2ea   :  { %v1638_v8 = vmul.f32 %v2208_v37, %v1620_v35 }
 0x2eb   :  { %v1892_v41 = vmul.f32 -1.442695, %v1631_v38 }
 0x2ec   :  { %v1639_v59 = vadd.f32 %v1638_v8, %v1577_v40 }
 0x2ed   :  { %2209 = vpow2.f32 %v1892_v41 }
 0x2f7   :  { %v2210_v9 = vpop.eup %2209 }
 0x2f8   :  { %v1635_v42 = vadd.f32 1.0, %v2210_v9 }
 0x2fa   :  { %2211 = vrcp.f32 %v1635_v42 }
 0x2fb   :  { %2213 = vtanh.f32 %v1639_v59 }
 0x304   :  { %v2212_v51 = vpop.eup %2211 }
 0x305   :  { %v1641_v10 = vsub.f32 1.0, %v2212_v51  ;;  %v2214_v11 = vpop.eup %2213  ;;  %v1643_v45 = vmul.f32 %v2215_v44, %v2212_v51 }
 0x307   :  { %v1642_v43 = vmul.f32 %v2214_v11, %v1641_v10 }
 0x309   :  { %v1644_v46 = vadd.f32 %v1643_v45, %v1642_v43 }
 0x30b   :  { %1647 = vst [vmem:[#allocation13] sm:$0xff] %v1644_v46  ;;  %1646 = vst [vmem:[#allocation14 + $0x8] sm:$0xff] %v1644_v46 }
 0x30c   :  { %2325 = shalt.err (!%p2322_p11)
}
 0x30d   :  { %s2326_s29 = scalar_lea.hbm %s2605_s5, 128 }
 0x30e   :  { %p2327_p12 = scmp.ne.s32.totalorder %s2605_s5, %s2326_s29  ;;  %p2330_p13 = scmp.lt.u32.totalorder %s2326_s29, %s2605_s5 }
 0x310   :  { %p2332_p0 = pnand %p2330_p13, %p2327_p12 }
 0x312   :  { %2335 = shalt.err (!%p2332_p0)
}
 0x313   :  { %1657 = dma.vmem_to_hbm [thread:$0]  %s1655_s23, 128, %s2605_s5, [#allocation5]  }
 0x314   :  { %s2336_s11 = scalar_lea.vmem %s2566_s25, 256  ;;  %p2341_p2 = scmp.lt.s32.totalorder %s2566_s25, %s2566_s25 }
 0x315   :  { %p2337_p1 = scmp.ne.s32.totalorder %s2566_s25, %s2336_s11  ;;  %p2342_p3 = scmp.lt.s32.totalorder %s2336_s11, %s2336_s11 }
 0x317   :  { %p2343_p4 = por %p2342_p3, %p2341_p2 }
 0x319   :  { %p2344_p5 = pnand %p2343_p4, %p2337_p1 }
 0x31b   :  { %2347 = shalt.err (!%p2344_p5)
}
 0x31c   :  { %s2348_s14 = scalar_lea.hbm %s2606_s6, 256 }
 0x31d   :  { %p2349_p6 = scmp.ne.s32.totalorder %s2606_s6, %s2348_s14  ;;  %p2352_p7 = scmp.lt.u32.totalorder %s2348_s14, %s2606_s6 }
 0x31f   :  { %p2354_p8 = pnand %p2352_p7, %p2349_p6 }
 0x321   :  { %2357 = shalt.err (!%p2354_p8)
}
 0x322   :  { %1669 = dma.vmem_to_hbm [thread:$0]  %s2566_s25, 256, %s2606_s6, [#allocation15], %s2375_s0, %s2375_s0, %s2376_s30  }
 0x323   :  { %2366 = dma.done.wait [#allocation5], 128  }
 0x324   :  { %2367 = vsyncadd [#allocation5], 4294967168 }
 0x325   :  { %2368 = dma.done.wait [#allocation15], 256  }
 0x326   :  { %2369 = vsyncadd [#allocation15], 4294967040 }
 0x327   :  { %1676 = vsyncpa [#allocation4], 1 }
 0x328   :  { %1677 = vsyncpa [#allocation9], 1 }
 0x329   :  { %1678 = vsyncpa [#allocation12], 1 }
 0x32a   :  { %1679 = vsyncpa [#allocation5], 1 }
 0x32b   :  { %1680 = vsyncpa [#allocation15], 1 }
 0x32c   :  { %1681 = vsyncpa [#allocation6], 1 }

</bundles_post_ra>
